<compile_context>
chip_gen: v5e
topology: v5e:2x2
jax: 0.10.0
libtpu: 0.0.40
codegen_flags: <defaults>
</compile_context>

<pallas_src>
import functools

import numpy as np
import jax
import jax.numpy as jnp
from jax import lax
from jax.experimental import pallas as pl
from jax.experimental.pallas import tpu as pltpu

NUM = 5                   # num
ATTN = NUM                # attnsize (ms=False)
OUT = NUM                 # outsize
IN_S = NUM                # per-step state features
IN_A = NUM + 1            # per-step action features
H1 = 1024
H2 = 512
H3 = ATTN + NUM           # fc3 / fc4 output width: 10
FLAT = ATTN * OUT         # 25
N_H1_CHUNKS = 2           # grid steps over H1 (pipelines the w2 stream)
TK = H1 // N_H1_CHUNKS    # 512

# Compile-time 0/1 selectors for the lane-flat outer product:
#   p_flat[:, c] = atn[:, c // NUM] * vals[:, c % NUM]
_cols = np.arange(FLAT)
_EK_NP = (np.arange(ATTN)[:, None] == (_cols // NUM)[None, :]).astype(np.float32)
_EJ_NP = (np.arange(ATTN)[:, None] == (_cols % NUM)[None, :]).astype(np.float32)


def _softmax_sigmoid(e):
    """Softmax over the first ATTN lanes, sigmoid over the rest (exact f32)."""
    logits = e[:, :ATTN]
    m = jnp.max(logits, axis=1, keepdims=True)
    ex = jnp.exp(logits - m)
    atn = ex / jnp.sum(ex, axis=1, keepdims=True)
    vals = 1.0 / (1.0 + jnp.exp(-e[:, ATTN:]))
    return atn, vals


def _ima_kernel(s_ref, a_ref, w1s_ref, w1a_ref, b1_ref, w2_ref, b2_ref,
                w3t_ref, b3_ref, w4_ref, b4_ref, ek_ref, ej_ref,
                o_ref, xsp_scr, xav_scr, acc2_scr, *, horizon, batch):
    k = pl.program_id(0)

    # ---- step 0: build the time-major row slabs (row = t*batch + b) ---------
    @pl.when(k == 0)
    def _():
        for t in range(horizon):
            cur = s_ref[:, t * NUM:(t + 1) * NUM]
            if t < horizon - 1:
                sp = s_ref[:, (t + 1) * NUM:(t + 2) * NUM] - cur
            else:
                sp = cur                                   # last row untouched
            xsp_scr[t * batch:(t + 1) * batch, :] = sp
            xav_scr[t * batch:(t + 1) * batch, :] = \
                a_ref[:, t * IN_A:(t + 1) * IN_A]
        acc2_scr[...] = jnp.zeros_like(acc2_scr)

    # ---- every step: fc1 on this H1 chunk + partial fc2 accumulation --------
    xsp = xsp_scr[...].astype(jnp.bfloat16)                        # (R, 5)
    xav = xav_scr[...].astype(jnp.bfloat16)                        # (R, 6)
    h1c = jnp.maximum(
        jnp.dot(xsp, w1s_ref[...], preferred_element_type=jnp.float32)
        + jnp.dot(xav, w1a_ref[...], preferred_element_type=jnp.float32)
        + b1_ref[...], 0.0)                                        # (R, TK) f32
    acc2_scr[...] += jnp.dot(h1c.astype(jnp.bfloat16), w2_ref[...],
                             preferred_element_type=jnp.float32)   # (R, 512)

    # ---- last step: fc3, attention, horizon reduce, fc4, output -------------
    @pl.when(k == pl.num_programs(0) - 1)
    def _():
        h2 = jnp.maximum(acc2_scr[...] + b2_ref[...], 0.0)         # (R, 512)
        # fc3: w3 stored pre-transposed (10, 512); contract on the lane dim.
        e3 = lax.dot_general(
            h2.astype(jnp.bfloat16), w3t_ref[...],
            dimension_numbers=(((1,), (1,)), ((), ())),
            preferred_element_type=jnp.float32) + b3_ref[...]      # (R, 10)

        atn, vals = _softmax_sigmoid(e3)
        ek = ek_ref[...]
        ej = ej_ref[...]
        # lane-flat outer product: p[:, c] = atn[:, c//5] * vals[:, c%5]
        p_rows = (jnp.dot(atn.astype(jnp.bfloat16), ek,
                          preferred_element_type=jnp.float32)
                  * jnp.dot(vals.astype(jnp.bfloat16), ej,
                            preferred_element_type=jnp.float32))   # (R, 25)

        acc = p_rows[0:batch, :]
        for t in range(1, horizon):          # static, sublane-aligned slices
            acc = acc + p_rows[t * batch:(t + 1) * batch, :]       # (B, 25)

        e4 = jnp.dot(acc.astype(jnp.bfloat16), w4_ref[...],
                     preferred_element_type=jnp.float32) + b4_ref[...]
        atn4, vals4 = _softmax_sigmoid(e4)
        o_ref[...] = acc + (jnp.dot(atn4.astype(jnp.bfloat16), ek,
                                    preferred_element_type=jnp.float32)
                            * jnp.dot(vals4.astype(jnp.bfloat16), ej,
                                      preferred_element_type=jnp.float32))


def prepare_params(params):
    """One-time parameter prep (NOT in the per-call path): bf16 casts,
    w1 split into state/action halves, w3 pre-transpose, selector constants."""
    w1, b1, w2, b2, w3, b3, w4, b4 = params
    return (
        w1[:NUM].astype(jnp.bfloat16),         # (5, 1024)
        w1[NUM:].astype(jnp.bfloat16),         # (6, 1024)
        b1,                                    # (1, 1024) f32
        w2.astype(jnp.bfloat16),               # (1024, 512)
        b2,                                    # (1, 512)  f32
        w3.T.astype(jnp.bfloat16),             # (10, 512)
        b3,                                    # (1, 10)   f32
        w4.astype(jnp.bfloat16),               # (25, 10)
        b4,                                    # (1, 10)   f32
        jnp.asarray(_EK_NP, jnp.bfloat16),     # (5, 25) selector (atn repeat)
        jnp.asarray(_EJ_NP, jnp.bfloat16),     # (5, 25) selector (vals tile)
    )


@functools.partial(jax.jit, static_argnames=("horizon",))
def iterative_model_attention(s, a, prepared, horizon):
    """s: (B, horizon*5) f32, a: (B, horizon*6) f32 -> (B, 25) f32."""
    B = s.shape[0]
    b_pad = (B + 7) // 8 * 8          # keep horizon slices sublane-aligned
    if b_pad != B:
        s = jnp.pad(s, ((0, b_pad - B), (0, 0)))
        a = jnp.pad(a, ((0, b_pad - B), (0, 0)))
    rows = horizon * b_pad

    kernel = functools.partial(_ima_kernel, horizon=horizon, batch=b_pad)
    out = pl.pallas_call(
        kernel,
        out_shape=jax.ShapeDtypeStruct((b_pad, FLAT), jnp.float32),
        grid=(N_H1_CHUNKS,),
        in_specs=[
            pl.BlockSpec((b_pad, horizon * IN_S), lambda k: (0, 0)),   # s
            pl.BlockSpec((b_pad, horizon * IN_A), lambda k: (0, 0)),   # a
            pl.BlockSpec((IN_S, TK), lambda k: (0, k)),                # w1 (state)
            pl.BlockSpec((IN_A, TK), lambda k: (0, k)),                # w1 (action)
            pl.BlockSpec((1, TK), lambda k: (0, k)),                   # b1
            pl.BlockSpec((TK, H2), lambda k: (k, 0)),                  # w2 (K-chunked)
            pl.BlockSpec((1, H2), lambda k: (0, 0)),                   # b2
            pl.BlockSpec((H3, H2), lambda k: (0, 0)),                  # w3^T
            pl.BlockSpec((1, H3), lambda k: (0, 0)),                   # b3
            pl.BlockSpec((FLAT, H3), lambda k: (0, 0)),                # w4
            pl.BlockSpec((1, H3), lambda k: (0, 0)),                   # b4
            pl.BlockSpec((ATTN, FLAT), lambda k: (0, 0)),              # ek selector
            pl.BlockSpec((ATTN, FLAT), lambda k: (0, 0)),              # ej selector
        ],
        out_specs=pl.BlockSpec((b_pad, FLAT), lambda k: (0, 0)),
        scratch_shapes=[
            pltpu.VMEM((rows, IN_S), jnp.float32),     # time-major sp slab
            pltpu.VMEM((rows, IN_A), jnp.float32),     # time-major a slab
            pltpu.VMEM((rows, H2), jnp.float32),       # fc2 accumulator
        ],
        compiler_params=pltpu.CompilerParams(
            dimension_semantics=("arbitrary",)),
    )(s, a, *prepared)
    return out[:B]


def init_params(key):
    """Deterministic init mimicking nn.Linear (uniform +-1/sqrt(fan_in))."""
    def linear(k, fan_in, fan_out):
        kw, kb = jax.random.split(k)
        bound = 1.0 / (fan_in ** 0.5)
        w = jax.random.uniform(kw, (fan_in, fan_out), jnp.float32, -bound, bound)
        b = jax.random.uniform(kb, (1, fan_out), jnp.float32, -bound, bound)
        return w, b
    ks = jax.random.split(key, 4)
    w1, b1 = linear(ks[0], 2 * NUM + 1, H1)
    w2, b2 = linear(ks[1], H1, H2)
    w3, b3 = linear(ks[2], H2, H3)
    w4, b4 = linear(ks[3], ATTN * OUT, H3)
    return (w1, b1, w2, b2, w3, b3, w4, b4)


def reference(s, a, params, horizon):
    """Pure-JAX f32 reference of the PyTorch forward (eval-mode dropout)."""
    w1, b1, w2, b2, w3, b3, w4, b4 = params
    B = s.shape[0]
    sp = s.reshape(B, horizon, NUM)
    sp = jnp.concatenate([sp[:, 1:] - sp[:, :-1], sp[:, -1:]], axis=1)
    av = a.reshape(B, horizon, NUM + 1)
    e = jnp.concatenate([sp, av], axis=2)
    p = jnp.zeros((B, ATTN, OUT), jnp.float32)
    for i in range(horizon):
        x = e[:, i, :]
        h1 = jax.nn.relu(x @ w1 + b1)
        h2 = jax.nn.relu(h1 @ w2 + b2)
        e3 = h2 @ w3 + b3
        atn = jax.nn.softmax(e3[:, :ATTN], axis=1)[:, :, None]
        vals = jax.nn.sigmoid(e3[:, ATTN:])[:, None, :]
        p = p + atn * jnp.broadcast_to(vals, (B, ATTN, NUM))
    e3 = p.reshape(B, ATTN * NUM) @ w4 + b4
    atn = jax.nn.softmax(e3[:, :ATTN], axis=1)[:, :, None]
    vals = jax.nn.sigmoid(e3[:, ATTN:])[:, None, :]
    p = p + atn * jnp.broadcast_to(vals, (B, ATTN, NUM))
    return p.reshape(B, ATTN * NUM)


if __name__ == "__main__":
    key = jax.random.PRNGKey(0)
    horizon, B = 4, 8
    k_s, k_a, k_p = jax.random.split(key, 3)
    s = jax.random.normal(k_s, (B, horizon * NUM), jnp.float32)
    a = jax.random.normal(k_a, (B, horizon * (NUM + 1)), jnp.float32)
    params = init_params(k_p)
    prepared = prepare_params(params)      # one-time; outside the per-call path

    out = iterative_model_attention(s, a, prepared, horizon)
    out = jax.block_until_ready(out)

    ref = reference(s, a, params, horizon)
    assert out.shape == (B, ATTN * NUM), out.shape
    max_err = float(jnp.max(jnp.abs(out - ref)))
    assert jnp.allclose(out, ref, atol=5e-2, rtol=5e-2), max_err
    print("KERNEL_OK")
</pallas_src>

<mosaic_0001>
module attributes {stable_mosaic.version = 11 : i64} {
  func.func @_ima_kernel(%arg0: i32, %arg1: memref<8x20xf32, #tpu.memory_space<vmem>>, %arg2: memref<8x24xf32, #tpu.memory_space<vmem>>, %arg3: memref<5x512xbf16, #tpu.memory_space<vmem>>, %arg4: memref<6x512xbf16, #tpu.memory_space<vmem>>, %arg5: memref<1x512xf32, #tpu.memory_space<vmem>>, %arg6: memref<512x512xbf16, #tpu.memory_space<vmem>>, %arg7: memref<1x512xf32, #tpu.memory_space<vmem>>, %arg8: memref<10x512xbf16, #tpu.memory_space<vmem>>, %arg9: memref<1x10xf32, #tpu.memory_space<vmem>>, %arg10: memref<25x10xbf16, #tpu.memory_space<vmem>>, %arg11: memref<1x10xf32, #tpu.memory_space<vmem>>, %arg12: memref<5x25xbf16, #tpu.memory_space<vmem>>, %arg13: memref<5x25xbf16, #tpu.memory_space<vmem>>, %arg14: memref<8x25xf32, #tpu.memory_space<vmem>>, %arg15: memref<32x5xf32, #tpu.memory_space<vmem>>, %arg16: memref<32x6xf32, #tpu.memory_space<vmem>>, %arg17: memref<32x512xf32, #tpu.memory_space<vmem>>) attributes {dimension_semantics = [#tpu.dimension_semantics<arbitrary>], iteration_bounds = array<i64: 2>, scalar_prefetch = 0 : i64, scratch_operands = 3 : i64, tpu.core_type = #tpu.core_type<tc>, window_params = [{pipeline_mode = #tpu.pipeline_mode<synchronous>, transform_indices = @transform_0, window_bounds = array<i64: 8, 20>}, {pipeline_mode = #tpu.pipeline_mode<synchronous>, transform_indices = @transform_1, window_bounds = array<i64: 8, 24>}, {transform_indices = @transform_2, window_bounds = array<i64: 5, 512>}, {transform_indices = @transform_3, window_bounds = array<i64: 6, 512>}, {transform_indices = @transform_4, window_bounds = array<i64: 1, 512>}, {transform_indices = @transform_5, window_bounds = array<i64: 512, 512>}, {pipeline_mode = #tpu.pipeline_mode<synchronous>, transform_indices = @transform_6, window_bounds = array<i64: 1, 512>}, {pipeline_mode = #tpu.pipeline_mode<synchronous>, transform_indices = @transform_7, window_bounds = array<i64: 10, 512>}, {pipeline_mode = #tpu.pipeline_mode<synchronous>, transform_indices = @transform_8, window_bounds = array<i64: 1, 10>}, {pipeline_mode = #tpu.pipeline_mode<synchronous>, transform_indices = @transform_9, window_bounds = array<i64: 25, 10>}, {pipeline_mode = #tpu.pipeline_mode<synchronous>, transform_indices = @transform_10, window_bounds = array<i64: 1, 10>}, {pipeline_mode = #tpu.pipeline_mode<synchronous>, transform_indices = @transform_11, window_bounds = array<i64: 5, 25>}, {pipeline_mode = #tpu.pipeline_mode<synchronous>, transform_indices = @transform_12, window_bounds = array<i64: 5, 25>}, {pipeline_mode = #tpu.pipeline_mode<synchronous>, transform_indices = @transform_13, window_bounds = array<i64: 8, 25>}]} {
    %c0_i32 = arith.constant 0 : i32
    %0 = arith.cmpi eq, %arg0, %c0_i32 : i32
    %1 = arith.extui %0 : i1 to i32
    %c0_i32_0 = arith.constant 0 : i32
    %2 = arith.cmpi ne, %1, %c0_i32_0 : i32
    scf.if %2 {
      %c0_20 = arith.constant 0 : index
      %c0_21 = arith.constant 0 : index
      %26 = vector.load %arg1[%c0_20, %c0_21] : memref<8x20xf32, #tpu.memory_space<vmem>>, vector<8x5xf32>
      %c0_22 = arith.constant 0 : index
      %c5 = arith.constant 5 : index
      %27 = vector.load %arg1[%c0_22, %c5] : memref<8x20xf32, #tpu.memory_space<vmem>>, vector<8x5xf32>
      %28 = arith.subf %27, %26 : vector<8x5xf32>
      %c0_23 = arith.constant 0 : index
      %c0_24 = arith.constant 0 : index
      %29 = vector.load %arg15[%c0_23, %c0_24] : memref<32x5xf32, #tpu.memory_space<vmem>>, vector<8x5xf32>
      tpu.vector_store %arg15[%c0_23, %c0_24], %28 {strides = array<i32>} : memref<32x5xf32, #tpu.memory_space<vmem>>, vector<8x5xf32>,
      %c0_25 = arith.constant 0 : index
      %c0_26 = arith.constant 0 : index
      %30 = vector.load %arg2[%c0_25, %c0_26] : memref<8x24xf32, #tpu.memory_space<vmem>>, vector<8x6xf32>
      %c0_27 = arith.constant 0 : index
      %c0_28 = arith.constant 0 : index
      %31 = vector.load %arg16[%c0_27, %c0_28] : memref<32x6xf32, #tpu.memory_space<vmem>>, vector<8x6xf32>
      tpu.vector_store %arg16[%c0_27, %c0_28], %30 {strides = array<i32>} : memref<32x6xf32, #tpu.memory_space<vmem>>, vector<8x6xf32>,
      %c0_29 = arith.constant 0 : index
      %c5_30 = arith.constant 5 : index
      %32 = vector.load %arg1[%c0_29, %c5_30] : memref<8x20xf32, #tpu.memory_space<vmem>>, vector<8x5xf32>
      %c0_31 = arith.constant 0 : index
      %c10 = arith.constant 10 : index
      %33 = vector.load %arg1[%c0_31, %c10] : memref<8x20xf32, #tpu.memory_space<vmem>>, vector<8x5xf32>
      %34 = arith.subf %33, %32 : vector<8x5xf32>
      %c8 = arith.constant 8 : index
      %c0_32 = arith.constant 0 : index
      %35 = vector.load %arg15[%c8, %c0_32] : memref<32x5xf32, #tpu.memory_space<vmem>>, vector<8x5xf32>
      tpu.vector_store %arg15[%c8, %c0_32], %34 {strides = array<i32>} : memref<32x5xf32, #tpu.memory_space<vmem>>, vector<8x5xf32>,
      %c0_33 = arith.constant 0 : index
      %c6 = arith.constant 6 : index
      %36 = vector.load %arg2[%c0_33, %c6] : memref<8x24xf32, #tpu.memory_space<vmem>>, vector<8x6xf32>
      %c8_34 = arith.constant 8 : index
      %c0_35 = arith.constant 0 : index
      %37 = vector.load %arg16[%c8_34, %c0_35] : memref<32x6xf32, #tpu.memory_space<vmem>>, vector<8x6xf32>
      tpu.vector_store %arg16[%c8_34, %c0_35], %36 {strides = array<i32>} : memref<32x6xf32, #tpu.memory_space<vmem>>, vector<8x6xf32>,
      %c0_36 = arith.constant 0 : index
      %c10_37 = arith.constant 10 : index
      %38 = vector.load %arg1[%c0_36, %c10_37] : memref<8x20xf32, #tpu.memory_space<vmem>>, vector<8x5xf32>
      %c0_38 = arith.constant 0 : index
      %c15 = arith.constant 15 : index
      %39 = vector.load %arg1[%c0_38, %c15] : memref<8x20xf32, #tpu.memory_space<vmem>>, vector<8x5xf32>
      %40 = arith.subf %39, %38 : vector<8x5xf32>
      %c16 = arith.constant 16 : index
      %c0_39 = arith.constant 0 : index
      %41 = vector.load %arg15[%c16, %c0_39] : memref<32x5xf32, #tpu.memory_space<vmem>>, vector<8x5xf32>
      tpu.vector_store %arg15[%c16, %c0_39], %40 {strides = array<i32>} : memref<32x5xf32, #tpu.memory_space<vmem>>, vector<8x5xf32>,
      %c0_40 = arith.constant 0 : index
      %c12 = arith.constant 12 : index
      %42 = vector.load %arg2[%c0_40, %c12] : memref<8x24xf32, #tpu.memory_space<vmem>>, vector<8x6xf32>
      %c16_41 = arith.constant 16 : index
      %c0_42 = arith.constant 0 : index
      %43 = vector.load %arg16[%c16_41, %c0_42] : memref<32x6xf32, #tpu.memory_space<vmem>>, vector<8x6xf32>
      tpu.vector_store %arg16[%c16_41, %c0_42], %42 {strides = array<i32>} : memref<32x6xf32, #tpu.memory_space<vmem>>, vector<8x6xf32>,
      %c0_43 = arith.constant 0 : index
      %c15_44 = arith.constant 15 : index
      %44 = vector.load %arg1[%c0_43, %c15_44] : memref<8x20xf32, #tpu.memory_space<vmem>>, vector<8x5xf32>
      %c24 = arith.constant 24 : index
      %c0_45 = arith.constant 0 : index
      %45 = vector.load %arg15[%c24, %c0_45] : memref<32x5xf32, #tpu.memory_space<vmem>>, vector<8x5xf32>
      tpu.vector_store %arg15[%c24, %c0_45], %44 {strides = array<i32>} : memref<32x5xf32, #tpu.memory_space<vmem>>, vector<8x5xf32>,
      %c0_46 = arith.constant 0 : index
      %c18 = arith.constant 18 : index
      %46 = vector.load %arg2[%c0_46, %c18] : memref<8x24xf32, #tpu.memory_space<vmem>>, vector<8x6xf32>
      %c24_47 = arith.constant 24 : index
      %c0_48 = arith.constant 0 : index
      %47 = vector.load %arg16[%c24_47, %c0_48] : memref<32x6xf32, #tpu.memory_space<vmem>>, vector<8x6xf32>
      tpu.vector_store %arg16[%c24_47, %c0_48], %46 {strides = array<i32>} : memref<32x6xf32, #tpu.memory_space<vmem>>, vector<8x6xf32>,
      %cst_49 = arith.constant 0.000000e+00 : f32
      %48 = vector.broadcast %cst_49 : f32 to vector<32x512xf32>
      %c0_50 = arith.constant 0 : index
      %c0_51 = arith.constant 0 : index
      %49 = vector.load %arg17[%c0_50, %c0_51] : memref<32x512xf32, #tpu.memory_space<vmem>>, vector<32x512xf32>
      tpu.vector_store %arg17[%c0_50, %c0_51], %48 {strides = array<i32>} : memref<32x512xf32, #tpu.memory_space<vmem>>, vector<32x512xf32>,
    } else {
    }
    %c0 = arith.constant 0 : index
    %c0_1 = arith.constant 0 : index
    %3 = vector.load %arg15[%c0, %c0_1] : memref<32x5xf32, #tpu.memory_space<vmem>>, vector<32x5xf32>
    %4 = arith.truncf %3 : vector<32x5xf32> to vector<32x5xbf16>
    %c0_2 = arith.constant 0 : index
    %c0_3 = arith.constant 0 : index
    %5 = vector.load %arg16[%c0_2, %c0_3] : memref<32x6xf32, #tpu.memory_space<vmem>>, vector<32x6xf32>
    %6 = arith.truncf %5 : vector<32x6xf32> to vector<32x6xbf16>
    %c0_4 = arith.constant 0 : index
    %c0_5 = arith.constant 0 : index
    %7 = vector.load %arg3[%c0_4, %c0_5] : memref<5x512xbf16, #tpu.memory_space<vmem>>, vector<5x512xbf16>
    %cst = arith.constant dense<0.000000e+00> : vector<32x512xf32>
    %8 = tpu.matmul %4, %7, %cst {dimension_numbers = #tpu.dot_dimension_numbers<[1], [0], [0], [1], [0, 0, 1, 1], [], []>} : vector<32x5xbf16>, vector<5x512xbf16>, vector<32x512xf32> -> vector<32x512xf32>
    %c0_6 = arith.constant 0 : index
    %c0_7 = arith.constant 0 : index
    %9 = vector.load %arg4[%c0_6, %c0_7] : memref<6x512xbf16, #tpu.memory_space<vmem>>, vector<6x512xbf16>
    %cst_8 = arith.constant dense<0.000000e+00> : vector<32x512xf32>
    %10 = tpu.matmul %6, %9, %cst_8 {dimension_numbers = #tpu.dot_dimension_numbers<[1], [0], [0], [1], [0, 0, 1, 1], [], []>} : vector<32x6xbf16>, vector<6x512xbf16>, vector<32x512xf32> -> vector<32x512xf32>
    %11 = arith.addf %8, %10 : vector<32x512xf32>
    %c0_9 = arith.constant 0 : index
    %c0_10 = arith.constant 0 : index
    %12 = vector.load %arg5[%c0_9, %c0_10] : memref<1x512xf32, #tpu.memory_space<vmem>>, vector<1x512xf32>
    %13 = vector.broadcast %12 : vector<1x512xf32> to vector<32x512xf32>
    %14 = arith.addf %11, %13 : vector<32x512xf32>
    %cst_11 = arith.constant 0.000000e+00 : f32
    %15 = vector.broadcast %cst_11 : f32 to vector<32x512xf32>
    %16 = arith.maximumf %14, %15 : vector<32x512xf32>
    %c0_12 = arith.constant 0 : index
    %c0_13 = arith.constant 0 : index
    %17 = vector.load %arg17[%c0_12, %c0_13] : memref<32x512xf32, #tpu.memory_space<vmem>>, vector<32x512xf32>
    %18 = arith.truncf %16 : vector<32x512xf32> to vector<32x512xbf16>
    %c0_14 = arith.constant 0 : index
    %c0_15 = arith.constant 0 : index
    %19 = vector.load %arg6[%c0_14, %c0_15] : memref<512x512xbf16, #tpu.memory_space<vmem>>, vector<512x512xbf16>
    %cst_16 = arith.constant dense<0.000000e+00> : vector<32x512xf32>
    %20 = tpu.matmul %18, %19, %cst_16 {dimension_numbers = #tpu.dot_dimension_numbers<[1], [0], [0], [1], [0, 0, 1, 1], [], []>} : vector<32x512xbf16>, vector<512x512xbf16>, vector<32x512xf32> -> vector<32x512xf32>
    %21 = arith.addf %17, %20 : vector<32x512xf32>
    %c0_17 = arith.constant 0 : index
    %c0_18 = arith.constant 0 : index
    %22 = vector.load %arg17[%c0_17, %c0_18] : memref<32x512xf32, #tpu.memory_space<vmem>>, vector<32x512xf32>
    tpu.vector_store %arg17[%c0_17, %c0_18], %21 {strides = array<i32>} : memref<32x512xf32, #tpu.memory_space<vmem>>, vector<32x512xf32>,
    %c1_i32 = arith.constant 1 : i32
    %23 = arith.cmpi eq, %arg0, %c1_i32 : i32
    %24 = arith.extui %23 : i1 to i32
    %c0_i32_19 = arith.constant 0 : i32
    %25 = arith.cmpi ne, %24, %c0_i32_19 : i32
    scf.if %25 {
      %c0_20 = arith.constant 0 : index
      %c0_21 = arith.constant 0 : index
      %26 = vector.load %arg17[%c0_20, %c0_21] : memref<32x512xf32, #tpu.memory_space<vmem>>, vector<32x512xf32>
      %c0_22 = arith.constant 0 : index
      %c0_23 = arith.constant 0 : index
      %27 = vector.load %arg7[%c0_22, %c0_23] : memref<1x512xf32, #tpu.memory_space<vmem>>, vector<1x512xf32>
      %28 = vector.broadcast %27 : vector<1x512xf32> to vector<32x512xf32>
      %29 = arith.addf %26, %28 : vector<32x512xf32>
      %cst_24 = arith.constant 0.000000e+00 : f32
      %30 = vector.broadcast %cst_24 : f32 to vector<32x512xf32>
      %31 = arith.maximumf %29, %30 : vector<32x512xf32>
      %32 = arith.truncf %31 : vector<32x512xf32> to vector<32x512xbf16>
      %c0_25 = arith.constant 0 : index
      %c0_26 = arith.constant 0 : index
      %33 = vector.load %arg8[%c0_25, %c0_26] : memref<10x512xbf16, #tpu.memory_space<vmem>>, vector<10x512xbf16>
      %cst_27 = arith.constant dense<0.000000e+00> : vector<32x10xf32>
      %34 = tpu.matmul %32, %33, %cst_27 {dimension_numbers = #tpu.dot_dimension_numbers<[1], [1], [0], [0], [0, 0, 1, 0], [], []>} : vector<32x512xbf16>, vector<10x512xbf16>, vector<32x10xf32> -> vector<32x10xf32>
      %c0_28 = arith.constant 0 : index
      %c0_29 = arith.constant 0 : index
      %35 = vector.load %arg9[%c0_28, %c0_29] : memref<1x10xf32, #tpu.memory_space<vmem>>, vector<1x10xf32>
      %36 = vector.broadcast %35 : vector<1x10xf32> to vector<32x10xf32>
      %37 = arith.addf %34, %36 : vector<32x10xf32>
      %38 = vector.extract_strided_slice %37 {offsets = [0, 0], sizes = [32, 5], strides = [1, 1]} : vector<32x10xf32> to vector<32x5xf32>
      %cst_30 = arith.constant dense<0xFF800000> : vector<32xf32>
      %39 = vector.multi_reduction <maximumf>, %38, %cst_30 [1] : vector<32x5xf32> to vector<32xf32>
      %40 = vector.shape_cast %39 : vector<32xf32> to vector<32x1xf32>
      %41 = vector.broadcast %40 : vector<32x1xf32> to vector<32x5xf32>
      %42 = arith.subf %38, %41 : vector<32x5xf32>
      %43 = math.exp %42 : vector<32x5xf32>
      %cst_31 = arith.constant dense<0.000000e+00> : vector<32xf32>
      %44 = vector.multi_reduction <add>, %43, %cst_31 [1] : vector<32x5xf32> to vector<32xf32>
      %45 = vector.shape_cast %44 : vector<32xf32> to vector<32x1xf32>
      %46 = vector.broadcast %45 : vector<32x1xf32> to vector<32x5xf32>
      %47 = arith.divf %43, %46 : vector<32x5xf32>
      %48 = vector.extract_strided_slice %37 {offsets = [0, 5], sizes = [32, 5], strides = [1, 1]} : vector<32x10xf32> to vector<32x5xf32>
      %cst_32 = arith.constant 0.000000e+00 : f32
      %49 = vector.broadcast %cst_32 : f32 to vector<32x5xf32>
      %50 = arith.subf %49, %48 : vector<32x5xf32>
      %51 = math.exp %50 : vector<32x5xf32>
      %cst_33 = arith.constant 1.000000e+00 : f32
      %52 = vector.broadcast %cst_33 : f32 to vector<32x5xf32>
      %53 = arith.addf %52, %51 : vector<32x5xf32>
      %cst_34 = arith.constant 1.000000e+00 : f32
      %54 = vector.broadcast %cst_34 : f32 to vector<32x5xf32>
      %55 = arith.divf %54, %53 : vector<32x5xf32>
      %c0_35 = arith.constant 0 : index
      %c0_36 = arith.constant 0 : index
      %56 = vector.load %arg12[%c0_35, %c0_36] : memref<5x25xbf16, #tpu.memory_space<vmem>>, vector<5x25xbf16>
      %c0_37 = arith.constant 0 : index
      %c0_38 = arith.constant 0 : index
      %57 = vector.load %arg13[%c0_37, %c0_38] : memref<5x25xbf16, #tpu.memory_space<vmem>>, vector<5x25xbf16>
      %58 = arith.truncf %47 : vector<32x5xf32> to vector<32x5xbf16>
      %cst_39 = arith.constant dense<0.000000e+00> : vector<32x25xf32>
      %59 = tpu.matmul %58, %56, %cst_39 {dimension_numbers = #tpu.dot_dimension_numbers<[1], [0], [0], [1], [0, 0, 1, 1], [], []>} : vector<32x5xbf16>, vector<5x25xbf16>, vector<32x25xf32> -> vector<32x25xf32>
      %60 = arith.truncf %55 : vector<32x5xf32> to vector<32x5xbf16>
      %cst_40 = arith.constant dense<0.000000e+00> : vector<32x25xf32>
      %61 = tpu.matmul %60, %57, %cst_40 {dimension_numbers = #tpu.dot_dimension_numbers<[1], [0], [0], [1], [0, 0, 1, 1], [], []>} : vector<32x5xbf16>, vector<5x25xbf16>, vector<32x25xf32> -> vector<32x25xf32>
      %62 = arith.mulf %59, %61 : vector<32x25xf32>
      %63 = vector.extract_strided_slice %62 {offsets = [0, 0], sizes = [8, 25], strides = [1, 1]} : vector<32x25xf32> to vector<8x25xf32>
      %64 = vector.extract_strided_slice %62 {offsets = [8, 0], sizes = [8, 25], strides = [1, 1]} : vector<32x25xf32> to vector<8x25xf32>
      %65 = arith.addf %63, %64 : vector<8x25xf32>
      %66 = vector.extract_strided_slice %62 {offsets = [16, 0], sizes = [8, 25], strides = [1, 1]} : vector<32x25xf32> to vector<8x25xf32>
      %67 = arith.addf %65, %66 : vector<8x25xf32>
      %68 = vector.extract_strided_slice %62 {offsets = [24, 0], sizes = [8, 25], strides = [1, 1]} : vector<32x25xf32> to vector<8x25xf32>
      %69 = arith.addf %67, %68 : vector<8x25xf32>
      %70 = arith.truncf %69 : vector<8x25xf32> to vector<8x25xbf16>
      %c0_41 = arith.constant 0 : index
      %c0_42 = arith.constant 0 : index
      %71 = vector.load %arg10[%c0_41, %c0_42] : memref<25x10xbf16, #tpu.memory_space<vmem>>, vector<25x10xbf16>
      %cst_43 = arith.constant dense<0.000000e+00> : vector<8x10xf32>
      %72 = tpu.matmul %70, %71, %cst_43 {dimension_numbers = #tpu.dot_dimension_numbers<[1], [0], [0], [1], [0, 0, 1, 1], [], []>} : vector<8x25xbf16>, vector<25x10xbf16>, vector<8x10xf32> -> vector<8x10xf32>
      %c0_44 = arith.constant 0 : index
      %c0_45 = arith.constant 0 : index
      %73 = vector.load %arg11[%c0_44, %c0_45] : memref<1x10xf32, #tpu.memory_space<vmem>>, vector<1x10xf32>
      %74 = vector.broadcast %73 : vector<1x10xf32> to vector<8x10xf32>
      %75 = arith.addf %72, %74 : vector<8x10xf32>
      %76 = vector.extract_strided_slice %75 {offsets = [0, 0], sizes = [8, 5], strides = [1, 1]} : vector<8x10xf32> to vector<8x5xf32>
      %cst_46 = arith.constant dense<0xFF800000> : vector<8xf32>
      %77 = vector.multi_reduction <maximumf>, %76, %cst_46 [1] : vector<8x5xf32> to vector<8xf32>
      %78 = vector.shape_cast %77 : vector<8xf32> to vector<8x1xf32>
      %79 = vector.broadcast %78 : vector<8x1xf32> to vector<8x5xf32>
      %80 = arith.subf %76, %79 : vector<8x5xf32>
      %81 = math.exp %80 : vector<8x5xf32>
      %cst_47 = arith.constant dense<0.000000e+00> : vector<8xf32>
      %82 = vector.multi_reduction <add>, %81, %cst_47 [1] : vector<8x5xf32> to vector<8xf32>
      %83 = vector.shape_cast %82 : vector<8xf32> to vector<8x1xf32>
      %84 = vector.broadcast %83 : vector<8x1xf32> to vector<8x5xf32>
      %85 = arith.divf %81, %84 : vector<8x5xf32>
      %86 = vector.extract_strided_slice %75 {offsets = [0, 5], sizes = [8, 5], strides = [1, 1]} : vector<8x10xf32> to vector<8x5xf32>
      %cst_48 = arith.constant 0.000000e+00 : f32
      %87 = vector.broadcast %cst_48 : f32 to vector<8x5xf32>
      %88 = arith.subf %87, %86 : vector<8x5xf32>
      %89 = math.exp %88 : vector<8x5xf32>
      %cst_49 = arith.constant 1.000000e+00 : f32
      %90 = vector.broadcast %cst_49 : f32 to vector<8x5xf32>
      %91 = arith.addf %90, %89 : vector<8x5xf32>
      %cst_50 = arith.constant 1.000000e+00 : f32
      %92 = vector.broadcast %cst_50 : f32 to vector<8x5xf32>
      %93 = arith.divf %92, %91 : vector<8x5xf32>
      %94 = arith.truncf %85 : vector<8x5xf32> to vector<8x5xbf16>
      %cst_51 = arith.constant dense<0.000000e+00> : vector<8x25xf32>
      %95 = tpu.matmul %94, %56, %cst_51 {dimension_numbers = #tpu.dot_dimension_numbers<[1], [0], [0], [1], [0, 0, 1, 1], [], []>} : vector<8x5xbf16>, vector<5x25xbf16>, vector<8x25xf32> -> vector<8x25xf32>
      %96 = arith.truncf %93 : vector<8x5xf32> to vector<8x5xbf16>
      %cst_52 = arith.constant dense<0.000000e+00> : vector<8x25xf32>
      %97 = tpu.matmul %96, %57, %cst_52 {dimension_numbers = #tpu.dot_dimension_numbers<[1], [0], [0], [1], [0, 0, 1, 1], [], []>} : vector<8x5xbf16>, vector<5x25xbf16>, vector<8x25xf32> -> vector<8x25xf32>
      %98 = arith.mulf %95, %97 : vector<8x25xf32>
      %99 = arith.addf %69, %98 : vector<8x25xf32>
      %c0_53 = arith.constant 0 : index
      %c0_54 = arith.constant 0 : index
      %100 = vector.load %arg14[%c0_53, %c0_54] : memref<8x25xf32, #tpu.memory_space<vmem>>, vector<8x25xf32>
      tpu.vector_store %arg14[%c0_53, %c0_54], %99 {strides = array<i32>} : memref<8x25xf32, #tpu.memory_space<vmem>>, vector<8x25xf32>,
    } else {
    }
    return
  }
  func.func @transform_0(%arg0: i32) -> (i32, i32) {
    %c0_i32 = arith.constant 0 : i32
    %c0_i32_0 = arith.constant 0 : i32
    %c0_i32_1 = arith.constant 0 : i32
    return %c0_i32, %c0_i32_0 : i32, i32
  }
  func.func @transform_1(%arg0: i32) -> (i32, i32) {
    %c0_i32 = arith.constant 0 : i32
    %c0_i32_0 = arith.constant 0 : i32
    %c0_i32_1 = arith.constant 0 : i32
    return %c0_i32, %c0_i32_0 : i32, i32
  }
  func.func @transform_2(%arg0: i32) -> (i32, i32) {
    %c0_i32 = arith.constant 0 : i32
    %c0_i32_0 = arith.constant 0 : i32
    return %c0_i32, %arg0 : i32, i32
  }
  func.func @transform_3(%arg0: i32) -> (i32, i32) {
    %c0_i32 = arith.constant 0 : i32
    %c0_i32_0 = arith.constant 0 : i32
    return %c0_i32, %arg0 : i32, i32
  }
  func.func @transform_4(%arg0: i32) -> (i32, i32) {
    %c0_i32 = arith.constant 0 : i32
    %c0_i32_0 = arith.constant 0 : i32
    return %c0_i32, %arg0 : i32, i32
  }
  func.func @transform_5(%arg0: i32) -> (i32, i32) {
    %c0_i32 = arith.constant 0 : i32
    %c0_i32_0 = arith.constant 0 : i32
    return %arg0, %c0_i32 : i32, i32
  }
  func.func @transform_6(%arg0: i32) -> (i32, i32) {
    %c0_i32 = arith.constant 0 : i32
    %c0_i32_0 = arith.constant 0 : i32
    %c0_i32_1 = arith.constant 0 : i32
    return %c0_i32, %c0_i32_0 : i32, i32
  }
  func.func @transform_7(%arg0: i32) -> (i32, i32) {
    %c0_i32 = arith.constant 0 : i32
    %c0_i32_0 = arith.constant 0 : i32
    %c0_i32_1 = arith.constant 0 : i32
    return %c0_i32, %c0_i32_0 : i32, i32
  }
  func.func @transform_8(%arg0: i32) -> (i32, i32) {
    %c0_i32 = arith.constant 0 : i32
    %c0_i32_0 = arith.constant 0 : i32
    %c0_i32_1 = arith.constant 0 : i32
    return %c0_i32, %c0_i32_0 : i32, i32
  }
  func.func @transform_9(%arg0: i32) -> (i32, i32) {
    %c0_i32 = arith.constant 0 : i32
    %c0_i32_0 = arith.constant 0 : i32
    %c0_i32_1 = arith.constant 0 : i32
    return %c0_i32, %c0_i32_0 : i32, i32
  }
  func.func @transform_10(%arg0: i32) -> (i32, i32) {
    %c0_i32 = arith.constant 0 : i32
    %c0_i32_0 = arith.constant 0 : i32
    %c0_i32_1 = arith.constant 0 : i32
    return %c0_i32, %c0_i32_0 : i32, i32
  }
  func.func @transform_11(%arg0: i32) -> (i32, i32) {
    %c0_i32 = arith.constant 0 : i32
    %c0_i32_0 = arith.constant 0 : i32
    %c0_i32_1 = arith.constant 0 : i32
    return %c0_i32, %c0_i32_0 : i32, i32
  }
  func.func @transform_12(%arg0: i32) -> (i32, i32) {
    %c0_i32 = arith.constant 0 : i32
    %c0_i32_0 = arith.constant 0 : i32
    %c0_i32_1 = arith.constant 0 : i32
    return %c0_i32, %c0_i32_0 : i32, i32
  }
  func.func @transform_13(%arg0: i32) -> (i32, i32) {
    %c0_i32 = arith.constant 0 : i32
    %c0_i32_0 = arith.constant 0 : i32
    %c0_i32_1 = arith.constant 0 : i32
    return %c0_i32, %c0_i32_0 : i32, i32
  }
}

</mosaic_0001>

<bundles_post_ra>
// kernel: iterative_model_attention.1
= control target key start
LH: loop header
LB: loop body
LE: loop exit
PB: predicated region body
PF: predicated region fallthrough
CT: control target
= control target key end

     0   :  { %s4899_s0 = inlined_call_operand.vmem [shape: f32[8,20], index: 0, kind: input, shape index: {}]   ;;  %s4900_s1 = inlined_call_operand.vmem [shape: f32[8,24], index: 1, kind: input, shape index: {}]   ;;  %s4901_s2 = inlined_call_operand.hbm [shape: bf16[5,1024], index: 2, kind: input, shape index: {}]   ;;  %s4902_s3 = inlined_call_operand.hbm [shape: bf16[6,1024], index: 3, kind: input, shape index: {}]   ;;  %s4903_s4 = inlined_call_operand.vmem [shape: f32[1,1024], index: 4, kind: input, shape index: {}]   ;;  %s4904_s5 = inlined_call_operand.hbm [shape: bf16[1024,512], index: 5, kind: input, shape index: {}]   ;;  %s4905_s6 = inlined_call_operand.hbm [shape: f32[1,512], index: 6, kind: input, shape index: {}]   ;;  %s4906_s7 = inlined_call_operand.hbm [shape: bf16[10,512], index: 7, kind: input, shape index: {}]   ;;  %s4907_s8 = inlined_call_operand.hbm [shape: f32[1,10], index: 8, kind: input, shape index: {}]   ;;  %s4908_s9 = inlined_call_operand.vmem [shape: bf16[25,10], index: 9, kind: input, shape index: {}]   ;;  %s4909_s10 = inlined_call_operand.vmem [shape: f32[1,10], index: 10, kind: input, shape index: {}]   ;;  %s4910_s11 = inlined_call_operand.hbm [shape: bf16[5,25], index: 11, kind: input, shape index: {}]   ;;  %s4911_s12 = inlined_call_operand.hbm [shape: bf16[5,25], index: 12, kind: input, shape index: {}]   ;;  %s4912_s13 = inlined_call_operand.hbm [shape: f32[8,25], index: 13, kind: output, shape index: {}]  }
   0x1   :  { %4921 = sst [smem:[#allocation29_spill]] %s4902_s3 }
   0x2   :  { %4922 = sst [smem:[#allocation30_spill]] %s4905_s6 }
   0x3   :  { %4923 = sst [smem:[#allocation31_spill]] %s4906_s7 }
   0x4   :  { %4924 = sst [smem:[#allocation32_spill]] %s4907_s8 }
   0x5   :  { %4925 = sst [smem:[#allocation33_spill]] %s4908_s9 }
   0x6   :  { %4926 = sst [smem:[#allocation34_spill]] %s4909_s10 }
   0x7   :  { %4927 = sst [smem:[#allocation35_spill]] %s4910_s11 }
   0x8   :  { %4928 = sst [smem:[#allocation36_spill]] %s4912_s13 }
   0x9   :  { %18 = vsyncpa [#allocation6], 0 }
   0xa   :  { %20 = vsyncpa [#allocation6 + $0x1], 0 }
   0xb   :  { %21 = vsyncpa [#allocation9], 0 }
   0xc   :  { %23 = vsyncpa [#allocation9 + $0x1], 0 }
   0xd   :  { %24 = vsyncpa [#allocation12], 0 }
   0xe   :  { %25 = vsyncpa [#allocation15], 0 }
   0xf   :  { %26 = vsyncpa [#allocation18], 0 }
  0x10   :  { %27 = vsyncpa [#allocation7], 0  ;;  %s4119_s25 = smov 0   ;;  %s4121_s26 = smov 0  }
  0x11   :  { %s4123_s27 = smov 0   ;;  %s4125_s28 = smov 0  }
  0x12 LB: > { %4929 = sst [smem:[#allocation26_spill]] %s4024_s27  ;;  %s4143_s15 = sadd.s32 4294967295, %s4028_s28   ;;  %s4028_s28 = sphi %s4125_s28, %s4953_s28   ;;  %s4024_s27 = sphi %s4123_s27, %s4955_s27   ;;  %s4020_s26 = sphi %s4121_s26, %s4957_s26   ;;  %s4016_s25 = sphi %s4119_s25, %s4956_s25  }
  0x13   : > { %s4930_s6 = sld [smem:[#allocation30_spill]]  ;;  %p2814_p0 = scmp.ge.s32.totalorder %s4028_s28, 1 }
  0x14   : > { %p96_p1 = scmp.eq.s32.totalorder %s4143_s15, 0  ;;  %p352_p2 = scmp.lt.s32.totalorder %s4028_s28, 3 }
  0x15   : > { %p2815_p3 = scmp.ne.s32.totalorder %s4143_s15, 0  ;;  %s4030_s17 = smov [#allocation11]  }
  0x16   : > { %p4149_p4 = pnand %p2814_p0, %p352_p2  ;;  %s372_s18 = sshll.u32 %s4030_s17, 4  ;;  %s373_s18 = int_to_ptr.vmem [resolvable:$true] %s372_s18 }
  0x17   : > { %s4932_s8 = sld [smem:[#allocation32_spill]]  ;;  %s4031_s23 = smov [#allocation14]  }
  0x18   : > { %p3574_p5 = pneg %p4149_p4  ;;  %s398_s24 = sshll.u32 %s4031_s23, 4  ;;  %s399_s24 = int_to_ptr.vmem [resolvable:$true] %s398_s24 }
  0x19   : > { %s370_s14 = sshll.u32 %s4930_s6, 4  ;;  %s4169_s29 = sadd.s32 1, %s4028_s28   ;;  %s371_s14 = int_to_ptr.hbm [resolvable:$true] %s370_s14 }
  0x1a   : > { %p4160_p6 = pnand %p3574_p5, %p96_p1  ;;  %4934 = sst [smem:[#allocation27_spill]] %s4169_s29 }
  0x1b   : > { %s82_s30 = sadd.s32 1, %s4024_s27  ;;  %s79_s17 = ssub.s32 %s4028_s28, %s4169_s29 }
  0x1c   : > { %3577 = dma.hbm_to_vmem [thread:$0]  (!%p4160_p6), %s371_s14, 64, %s373_s18, [#allocation12]  }
  0x1d   : > { %s396_s21 = sshll.u32 %s4932_s8, 4  ;;  %p89_p7 = scmp.ne.s32.totalorder %s4024_s27, %s4020_s26  ;;  %s397_s21 = int_to_ptr.hbm [resolvable:$true] %s396_s21 }
  0x1e   : > { %3583 = dma.hbm_to_vmem [thread:$0]  (!%p4160_p6), %s397_s21, 16, %s399_s24, [#allocation15]  }
  0x1f   : > { %p80_p8 = scmp.eq.s32.totalorder %s79_s17, 0  ;;  %p90_p9 = scmp.eq.s32.totalorder %s4028_s28, 0 }
  0x20   : > { %p95_p10 = scmp.ne.s32.totalorder %s4020_s26, %s4016_s25  ;;  %p3605_p11 = scmp.lt.s32.totalorder %s4028_s28, 2 }
  0x21   : > { %s4181_s19 = scalar_select %p80_p8, %s4024_s27, %s82_s30  }
  0x22   : > { %p91_p12 = por %p90_p9, %p89_p7  ;;  %p4185_p13 = por %p96_p1, %p95_p10 }
  0x23   : > { %4935 = sst [smem:[#allocation28_spill]] %s4181_s19  ;;  %s4190_s18 = sand.u32 1, %s4024_s27  }
  0x24   : > { %s4917_s20 = sshll.u32 %s4028_s28, 4  ;;  %s4916_s21 = sshll.u32 %s4190_s18, 4 }
  0x25   : > { %p4194_p0 = pnand %p3605_p11, %p91_p12  ;;  %s459_s25 = sand.u32 1, %s4028_s28  }
  0x26   : > { %s4938_s3 = sld [smem:[#allocation29_spill]]  ;;  %s463_s6 = scalar_lea.vmem [#allocation8], %s4916_s21 }
  0x27   : > { %s472_s8 = sshll.u32 %s463_s6, 4  ;;  %s2827_s27 = sshll.u32 %s4190_s18, 10  ;;  %s473_s8 = int_to_ptr.vmem [resolvable:$true] %s472_s8 }
  0x28   : > { %s4207_s29 = scalar_lea.sflag [#allocation9], %s459_s25  ;;  %p3770_p5 = pneg %p4194_p0 }
  0x2c   : > { %s468_s17 = scalar_lea.hbm %s4938_s3, %s4917_s20  ;;  %s3773_s6 = scalar_lea.hbm %s4938_s3, 32 }
  0x2d   : > { %s470_s19 = sshll.u32 %s468_s17, 4  ;;  %s471_s19 = int_to_ptr.hbm [resolvable:$true] %s470_s19 }
  0x2e   : > { %s3766_s13 = sshra.s32 %s471_s19, 4  ;;  %s3767_s13 = int_to_ptr.hbm [resolvable:$true] %s3766_s13 }
  0x2f   : > { %s3768_s10 = scalar_lea.hbm %s3767_s13, 16  ;;  %p3774_p9 = scmp.lt.s32.totalorder %s3767_s13, %s4938_s3 }
  0x30   : > { %p3769_p2 = scmp.ne.s32.totalorder %s3767_s13, %s3768_s10  ;;  %p3775_p10 = scmp.lt.s32.totalorder %s3773_s6, %s3768_s10 }
  0x32   : > { %p3771_p7 = pnand %p3770_p5, %p3769_p2  ;;  %p3776_p11 = por %p3775_p10, %p3774_p9 }
  0x34   : > { %p3772_p8 = pneg %p3771_p7 }
  0x36   : > { %p3777_p12 = pnand %p3776_p11, %p3772_p8 }
  0x38   : > { %3780 = shalt.err (!%p3777_p12)
}
  0x39   : > { %3596 = dma.hbm_to_vmem [thread:$0]  (!%p4194_p0), %s471_s19, 256, %s473_s8, %s4207_s29  }
  0x3a   : > { %s4939_s7 = sld [smem:[#allocation31_spill]]  ;;  %s4226_s24 = scalar_lea.vmem [#allocation10], %s2827_s27 }
  0x3b   : > { %s4032_s13 = smov [#allocation13]   ;;  %s4919_s21 = smov 256  }
  0x3c   : > { %s383_s10 = sshll.u32 %s4032_s13, 4  ;;  %s4920_s6 = smov 16   ;;  %s384_s10 = int_to_ptr.vmem [resolvable:$true] %s383_s10 }
  0x3d   : > { %s4940_s11 = sld [smem:[#allocation35_spill]]  ;;  %s4035_s20 = smov [#allocation16]  }
  0x3e   : > { %s416_s17 = sshll.u32 %s4035_s20, 4  ;;  %s426_s30 = sshll.u32 %s4911_s12, 4  ;;  %s417_s17 = int_to_ptr.vmem [resolvable:$true] %s416_s17  ;;  %s427_s30 = int_to_ptr.hbm [resolvable:$true] %s426_s30 }
  0x3f   : > { %s4036_s3 = smov [#allocation17]   ;;  %s3409_s25 = sshll.u32 %s4028_s28, 10 }
  0x40   : > { %s381_s9 = sshll.u32 %s4939_s7, 4  ;;  %s382_s9 = int_to_ptr.hbm [resolvable:$true] %s381_s9 }
  0x41   : > { %3580 = dma.hbm_to_vmem [thread:$0]  (!%p4160_p6), %s382_s9, 512, %s384_s10, [#allocation12], %s4919_s21, %s4919_s21, %s4920_s6  }
  0x42   : > { %s428_s9 = sshll.u32 %s4036_s3, 4  ;;  %s4941_s10 = sshll.u32 %s4028_s28, 4  ;;  %s429_s9 = int_to_ptr.vmem [resolvable:$true] %s428_s9 }
  0x43   : > { %s414_s27 = sshll.u32 %s4940_s11, 4  ;;  %s448_s20 = scalar_lea.hbm %s4901_s2, %s4941_s10  ;;  %s415_s27 = int_to_ptr.hbm [resolvable:$true] %s414_s27 }
  0x44   : > { %3586 = dma.hbm_to_vmem [thread:$0]  (!%p4160_p6), %s415_s27, 64, %s417_s17, [#allocation15]  }
  0x45   : > { %3589 = dma.hbm_to_vmem [thread:$0]  (!%p4160_p6), %s427_s30, 64, %s429_s9, [#allocation18]  }
  0x46   : > { %s4942_s21 = sshll.u32 %s4190_s18, 4  ;;  %s450_s11 = sshll.u32 %s448_s20, 4  ;;  %s451_s11 = int_to_ptr.hbm [resolvable:$true] %s450_s11 }
  0x47   : > { %s443_s6 = scalar_lea.vmem [#allocation5], %s4942_s21  ;;  %s440_s27 = scalar_lea.sflag [#allocation6], %s4190_s18 }
  0x48   : > { %s452_s7 = sshll.u32 %s443_s6, 4  ;;  %s3886_s17 = sshra.s32 %s451_s11, 4  ;;  %s453_s7 = int_to_ptr.vmem [resolvable:$true] %s452_s7  ;;  %s3887_s17 = int_to_ptr.hbm [resolvable:$true] %s3886_s17 }
  0x49   : > { %s3888_s13 = scalar_lea.hbm %s3887_s17, 16  ;;  %s3893_s30 = scalar_lea.hbm %s4901_s2, 32 }
  0x4a   : > { %p3889_p2 = scmp.ne.s32.totalorder %s3887_s17, %s3888_s13  ;;  %p3894_p8 = scmp.lt.s32.totalorder %s3887_s17, %s4901_s2 }
  0x4b   : > { %p3895_p9 = scmp.lt.s32.totalorder %s3893_s30, %s3888_s13 }
  0x4c   : > { %p3891_p6 = pnand %p3889_p2, %p3770_p5 }
  0x4d   : > { %p3896_p10 = por %p3895_p9, %p3894_p8 }
  0x4e   : > { %p3892_p7 = pneg %p3891_p6 }
  0x50   : > { %p3897_p11 = pnand %p3896_p10, %p3892_p7 }
  0x52   : > { %3900 = shalt.err (!%p3897_p11)
}
  0x53   : > { %3593 = dma.hbm_to_vmem [thread:$0]  (!%p4194_p0), %s451_s11, 256, %s453_s7, %s440_s27  }
  0x54   : > { %s4943_s28 = sshll.u32 %s4226_s24, 4  ;;  %s497_s10 = scalar_lea.hbm %s4904_s5, %s3409_s25  ;;  %s501_s28 = int_to_ptr.vmem [resolvable:$true] %s4943_s28 }
  0x55   : > { %s498_s8 = sshll.u32 %s497_s10, 4  ;;  %s3923_s7 = scalar_lea.hbm %s4904_s5, 2048  ;;  %s499_s8 = int_to_ptr.hbm [resolvable:$true] %s498_s8 }
  0x56   : > { %s3916_s19 = sshra.s32 %s499_s8, 4  ;;  %s3917_s19 = int_to_ptr.hbm [resolvable:$true] %s3916_s19 }
  0x57   : > { %s3918_s20 = scalar_lea.hbm %s3917_s19, 1024  ;;  %p3924_p7 = scmp.lt.s32.totalorder %s3917_s19, %s4904_s5 }
  0x58   : > { %p3919_p12 = scmp.ne.s32.totalorder %s3917_s19, %s3918_s20  ;;  %p3925_p8 = scmp.lt.s32.totalorder %s3923_s7, %s3918_s20 }
  0x5a   : > { %p3921_p2 = pnand %p3919_p12, %p3770_p5  ;;  %p3926_p9 = por %p3925_p8, %p3924_p7 }
  0x5c   : > { %p3922_p6 = pneg %p3921_p2 }
  0x5e   : > { %p3927_p10 = pnand %p3926_p9, %p3922_p6 }
  0x60   : > { %3930 = shalt.err (!%p3927_p10)
}
  0x61   : > { %s4944_s25 = smov 16   ;;  %s4945_s27 = smov 256  }
  0x62   : > { %3599 = dma.hbm_to_vmem [thread:$0]  (!%p4194_p0), %s499_s8, 16384, %s501_s28, %s4207_s29, %s4945_s27, %s4945_s27, %s4944_s25  }
  0x63   : > { %512 = sbr.rel (%p4149_p4) target bundleno = 1945 (0x799), region = 72  ;;  %s514_s3 = sand.u32 (!%p4149_p4), 1, %s4020_s26  }
  0x64   : > { %s2832_s22 = sshll.u32 (!%p4149_p4), %s514_s3, 4  ;;  %s515_s30 = scalar_lea.sflag (!%p4149_p4), [#allocation6], %s514_s3 }
  0x65   : > { %s4287_s9 = scalar_lea.vmem (!%p4149_p4), [#allocation5], %s2832_s22 }
  0x68   : > { %3991 = dma.done.wait (%p4185_p13), %s515_s30, 256  }
  0x69   : > { %3993 = vsyncadd (%p4185_p13), %s515_s30, 4294967040  ;;  %s524_s23 = sand.u32 1, %s4143_s15   ;;  %s4294_s29 = scalar_lea.vmem [#allocation8], %s2832_s22 }
  0x6a   : > { %s525_s21 = scalar_lea.sflag [#allocation9], %s524_s23 }
  0x6b   : > { %3995 = dma.done.wait (%p4185_p13), %s525_s21, 16640  }
  0x6c   : > { %3997 = vsyncadd (%p4185_p13), %s525_s21, 4294950656  ;;  %s2834_s16 = sshll.u32 %s514_s3, 10 }
  0x6d   : > { %s4300_s28 = scalar_lea.vmem [#allocation10], %s2834_s16 }
  0x6e   : > { %3999 = dma.done.wait (%p96_p1), [#allocation12], 576  }
  0x6f   : > { %4001 = vsyncadd (%p96_p1), [#allocation12], 4294966720 }
  0x70   : > { %4003 = dma.done.wait (%p96_p1), [#allocation15], 80  }
  0x71   : > { %4005 = vsyncadd (%p96_p1), [#allocation15], 4294967216 }
  0x72   : > { %4007 = dma.done.wait (%p96_p1), [#allocation18], 64  }
  0x73   : > { %4009 = vsyncadd (%p96_p1), [#allocation18], 4294967232  ;;  %s2840_s14 = sshll.u32 %s4143_s15, 2  ;;  %628 = sbr.rel (%p2815_p3) target bundleno = 363 (0x16b), region = 108 }
  0x74   : > { %p619_p4 = scmp.lt.s32.totalorder %s2840_s14, 7  ;;  %s4037_s20 = smov (!%p2815_p3), 5  }
  0x75   : > { %s4038_s7 = smov (!%p2815_p3), 122   ;;  %s4039_s11 = smov (!%p2815_p3), 113  }
  0x76   : > { %s4959_s14 = smov (!%p619_p4, %s2840_s14), 7  ;;  %s4040_s24 = smov (!%p2815_p3), 123  }
  0x77   : > { %s621_s10 = scalar_lea.vmem %s4903_s4, %s4959_s14  ;;  %s4041_s25 = smov (!%p2815_p3), 110  }
  0x78   : > { %v661_v0 = vld [vmem:[%s4899_s0] sm:$0xff]  ;;  %s4042_s27 = smov 116   ;;  %s4043_s3 = smov 118   ;;  %vm642_vm0 = vcmask 48128   ;;  %v4044_v9 = vmov 0.0   ;;  %vm639_vm1 = vcmask 39936  }
  0x79   : > { %663 = vrot.lane.b32.xlu1 %v661_v0, %s4037_s20  ;;  %631 = vrot.lane.b32.xlu0 %v661_v0, %s4037_s20  ;;  %v684_v1 = vld [vmem:[%s4900_s1] sm:$0xff]  ;;  %690 = vst [vmem:[#allocation4 + $0x30] sm:$0xff] %v4044_v9 }
  0x7a   : > { %657 = vrot.lane.b32.xlu2 %v684_v1, %s4038_s7  ;;  %643 = vst.msk [vmem:[#allocation3] sm:$0xff] %vm642_vm0, %v684_v1 }
  0x7b   : > { %691 = vst [vmem:[#allocation4] sm:$0xff] %v4044_v9 }
  0x7c   : > { %692 = vst [vmem:[#allocation4 + $0x58] sm:$0xff] %v4044_v9 }
  0x7d   : > { %693 = vst [vmem:[#allocation4 + $0x18] sm:$0xff] %v4044_v9 }
  0x7e   : > { %694 = vst [vmem:[#allocation4 + $0x50] sm:$0xff] %v4044_v9 }
  0x7f   : > { %695 = vst [vmem:[#allocation4 + $0x68] sm:$0xff] %v4044_v9 }
  0x80   : > { %696 = vst [vmem:[#allocation4 + $0x8] sm:$0xff] %v4044_v9 }
  0x81   : > { %646 = vrot.lane.b32.xlu0 %v661_v0, %s4037_s20  ;;  %697 = vst [vmem:[#allocation4 + $0x48] sm:$0xff] %v4044_v9 }
  0x82   : > { %698 = vst [vmem:[#allocation4 + $0x40] sm:$0xff] %v4044_v9 }
  0x83   : > { %699 = vst [vmem:[#allocation4 + $0x20] sm:$0xff] %v4044_v9 }
  0x84   : > { %700 = vst [vmem:[#allocation4 + $0x10] sm:$0xff] %v4044_v9 }
  0x85   : > { %701 = vst [vmem:[#allocation4 + $0x38] sm:$0xff] %v4044_v9 }
  0x86   : > { %702 = vst [vmem:[#allocation4 + $0x60] sm:$0xff] %v4044_v9 }
  0x87   : > { %703 = vst [vmem:[#allocation4 + $0x70] sm:$0xff] %v4044_v9 }
  0x88   : > { %704 = vst [vmem:[#allocation4 + $0x78] sm:$0xff] %v4044_v9 }
  0x89   : > { %705 = vst [vmem:[#allocation4 + $0x28] sm:$0xff] %v4044_v9 }
  0xd4   : > { %v658_v8 = vpop.permute.xlu2 %657 }
  0xd5   : > { %660 = vst.msk [vmem:[#allocation3 + $0x8] sm:$0xff] %vm642_vm0, %v658_v8 }
  0xeb   : > { %v664_v2 = vpop.permute.xlu1 %663  ;;  %v632_v3 = vpop.permute.xlu0 %631 }
  0xec   : > { %v666_v4 = vsub.f32 %v661_v0, %v664_v2  ;;  %v634_v5 = vsub.f32 %v661_v0, %v632_v3 }
  0xee   : > { %668 = vrot.lane.b32.xlu0 %v666_v4, %s4039_s11  ;;  %636 = vrot.lane.b32.xlu1 %v634_v5, %s4040_s24 }
  0xf3   : > { %v647_v6 = vpop.permute.xlu0 %646 }
  0xf4   : > { %v649_v7 = vsub.f32 %v661_v0, %v647_v6 }
  0xf6   : > { %686 = vrot.lane.b32.xlu0 %v684_v1, %s4041_s25  ;;  %674 = vrot.lane.b32.xlu1 %v684_v1, %s4042_s27 }
  0xf7   : > { %651 = vrot.lane.b32.xlu2 %v649_v7, %s4043_s3 }
  0xff   : > { %680 = vrot.lane.b32.xlu2 %v661_v0, %s4039_s11 }
 0x151   : > { %v652_v10 = vpop.permute.xlu2 %651 }
 0x152   : > { %654 = vst.msk [vmem:[#allocation2 + $0x8] sm:$0xff] %vm639_vm1, %v652_v10 }
 0x159   : > { %v681_v11 = vpop.permute.xlu2 %680 }
 0x15a   : > { %683 = vst.msk [vmem:[#allocation2 + $0x18] sm:$0xff] %vm639_vm1, %v681_v11 }
 0x160   : > { %v637_v12 = vpop.permute.xlu1 %636  ;;  %v669_v13 = vpop.permute.xlu0 %668 }
 0x161   : > { %640 = vst.msk [vmem:[#allocation2] sm:$0xff] %vm639_vm1, %v637_v12 }
 0x162   : > { %671 = vst.msk [vmem:[#allocation2 + $0x10] sm:$0xff] %vm639_vm1, %v669_v13 }
 0x168   : > { %v675_v14 = vpop.permute.xlu1 %674  ;;  %v687_v15 = vpop.permute.xlu0 %686 }
 0x169   : > { %677 = vst.msk [vmem:[#allocation3 + $0x10] sm:$0xff] %vm642_vm0, %v675_v14 }
 0x16a   : > { %689 = vst.msk [vmem:[#allocation3 + $0x18] sm:$0xff] %vm642_vm0, %v687_v15 }
 0x16b PF: > { %v720_v16 = vld [vmem:[%s4294_s29] sm:$0x77]  ;;  %vm739_vm2 = vcmask 1042432   ;;  %v721_v17 = vld [vmem:[%s4294_s29 + $0x8] sm:$0x77]  ;;  %vm732_vm3 = vcmask 48128  }
 0x16c   : > { %v712_v18 = vld [vmem:[#allocation3] sm:$0xff]  ;;  %v724_v19 = vunpack.c.l.b16 %v720_v16  ;;  %v725_v20 = vunpack.c.h.b16 %v720_v16  ;;  %v726_v21 = vunpack.c.l.b16 %v721_v17  ;;  %v727_v22 = vunpack.c.h.b16 %v721_v17  ;;  %v713_v23 = vld [vmem:[#allocation3 + $0x8] sm:$0xff]  ;;  %v708_v56 = vld [vmem:[#allocation2 + $0x10] sm:$0xff]  ;;  %p3370_p1 = scmp.ne.s32.totalorder %s4143_s15, 1 }
 0x16d   : > { %v719_v24 = vld [vmem:[%s4287_s9 + $0x8] sm:$0x77]  ;;  %v718_v25 = vld [vmem:[%s4287_s9] sm:$0x77]  ;;  %v716_v26 = vpack.c.bf16 %v713_v23, %v712_v18  ;;  %vm845_vm4 = vcmask 1041408   ;;  %v4045_v39 = vmov 65535  }
 0x16e   : > { %v832_v27 = vunpack.c.l.b16 %v719_v24  ;;  %v728_v28 = vpack.c.b16 %v724_v19, %v724_v19  ;;  %v729_v29 = vpack.c.b16 %v725_v20, %v725_v20  ;;  %v730_v30 = vpack.c.b16 %v726_v21, %v726_v21  ;;  %v706_v53 = vld [vmem:[#allocation2] sm:$0xff]  ;;  %v707_v54 = vld [vmem:[#allocation2 + $0x8] sm:$0xff]  ;;  %v709_v57 = vld [vmem:[#allocation2 + $0x18] sm:$0xff]  ;;  %s4046_s9 = smov (!%p3370_p1), 123   ;;  %s4950_s29 = sld [smem:[#allocation33_spill]] (!%p3370_p1) }
 0x16f   : > { %v731_v31 = vpack.c.b16 %v727_v22, %v727_v22  ;;  %v833_v33 = vunpack.c.h.b16 %v719_v24  ;;  %v830_v34 = vunpack.c.l.b16 %v718_v25  ;;  %v846_v40 = vsel %vm845_vm4, 4294967295, %v4045_v39  ;;  %v2972_v59 = vld [vmem:[%s4300_s28 + $0xe0] sm:$0xf]  ;;  %v3440_v60 = vld [vmem:[%s4300_s28 + $0xec] sm:$0xf0]  ;;  %s4951_s8 = sld [smem:[#allocation34_spill]] (!%p3370_p1) }
 0x170   : > { %v836_v32 = vpack.c.b16 %v832_v27, %v832_v27  ;;  %v741_v35 = vsel %vm739_vm2, %v728_v28, 0  ;;  %v744_v36 = vsel %vm739_vm2, %v729_v29, 0  ;;  %v747_v37 = vsel %vm739_vm2, %v730_v30, 0  ;;  %v714_v50 = vld [vmem:[#allocation3 + $0x10] sm:$0xff]  ;;  %v3100_v61 = vld [vmem:[%s4300_s28 + $0x1e0] sm:$0xf] }
 0x171   : > { %v750_v38 = vsel %vm739_vm2, %v731_v31, 0  ;;  %759 = vmatpush.bf16.msra.mxu0 %v741_v35  ;;  %778 = vmatpush.bf16.msra.mxu1 %v744_v36  ;;  %v837_v41 = vpack.c.b16 %v833_v33, %v833_v33  ;;  %v834_v42 = vpack.c.b16 %v830_v34, %v830_v34  ;;  %v831_v43 = vunpack.c.h.b16 %v718_v25  ;;  %v715_v51 = vld [vmem:[#allocation3 + $0x18] sm:$0xff]  ;;  %v3472_v63 = vld [vmem:[%s4300_s28 + $0x1ec] sm:$0xf0]  ;;  %v2956_v1 = vld [vmem:[%s4300_s28 + $0xc0] sm:$0xf] }
 0x172   : > { %797 = vmatpush.bf16.msra.mxu2 %v747_v37  ;;  %816 = vmatpush.bf16.msra.mxu3 %v750_v38  ;;  %v4346_v44 = vsel %vm739_vm2, %v846_v40, 0  ;;  %v717_v52 = vpack.c.bf16 %v715_v51, %v714_v50  ;;  %v710_v55 = vpack.c.bf16 %v707_v54, %v706_v53  ;;  %vm838_vm5 = vcmask 39936   ;;  %v3436_v2 = vld [vmem:[%s4300_s28 + $0xcc] sm:$0xf0]  ;;  %v3084_v3 = vld [vmem:[%s4300_s28 + $0x1c0] sm:$0xf] }
 0x173   : > { %v855_v45 = vand.u32 %v4346_v44, %v836_v32  ;;  %v858_v46 = vand.u32 %v4346_v44, %v837_v41  ;;  %v849_v47 = vand.u32 %v4346_v44, %v834_v42  ;;  %v835_v48 = vpack.c.b16 %v831_v43, %v831_v43  ;;  %v3468_v5 = vld [vmem:[%s4300_s28 + $0x1cc] sm:$0xf0]  ;;  %v3228_v7 = vld [vmem:[%s4300_s28 + $0x2e0] sm:$0xf] }
 0x174   : > { %2842 = vmatmul.msk.bf16.vlgmr.msra.gmra.mxu0 %vm732_vm3, %v716_v26  ;;  %2844 = vmatmul.msk.bf16.vlgmr.msra.gmra.mxu1 %vm732_vm3, %v716_v26  ;;  %v711_v58 = vpack.c.bf16 %v709_v57, %v708_v56  ;;  %v2973_v62 = vor.u32 %v3440_v60, %v2972_v59  ;;  %v3101_v0 = vor.u32 %v3472_v63, %v3100_v61  ;;  %v3504_v8 = vld [vmem:[%s4300_s28 + $0x2ec] sm:$0xf0]  ;;  %v3356_v9 = vld [vmem:[%s4300_s28 + $0x3e0] sm:$0xf] }
 0x175   : > { %2846 = vmatmul.msk.bf16.vlgmr.msra.gmra.mxu2 %vm732_vm3, %v716_v26  ;;  %2848 = vmatmul.msk.bf16.vlgmr.msra.gmra.mxu3 %vm732_vm3, %v716_v26  ;;  %v852_v49 = vand.u32 %v4346_v44, %v835_v48  ;;  %v2957_v4 = vor.u32 %v3436_v2, %v2956_v1  ;;  %v3085_v6 = vor.u32 %v3468_v5, %v3084_v3  ;;  %v3536_v11 = vld [vmem:[%s4300_s28 + $0x3ec] sm:$0xf0]  ;;  %v2940_v13 = vld [vmem:[%s4300_s28 + $0xa0] sm:$0xf] }
 0x176   : > { %905 = vmatpush.bf16.msrb.mxu2 %v855_v45  ;;  %924 = vmatpush.bf16.msrb.mxu3 %v858_v46  ;;  %v3229_v10 = vor.u32 %v3504_v8, %v3228_v7  ;;  %v3357_v12 = vor.u32 %v3536_v11, %v3356_v9  ;;  %v3432_v14 = vld [vmem:[%s4300_s28 + $0xac] sm:$0xf0]  ;;  %v3068_v15 = vld [vmem:[%s4300_s28 + $0x1a0] sm:$0xf] }
 0x177   : > { %867 = vmatpush.bf16.msrb.mxu0 %v849_v47  ;;  %886 = vmatpush.bf16.msrb.mxu1 %v852_v49  ;;  %v2941_v16 = vor.u32 %v3432_v14, %v2940_v13  ;;  %v3464_v17 = vld [vmem:[%s4300_s28 + $0x1ac] sm:$0xf0]  ;;  %v3212_v18 = vld [vmem:[%s4300_s28 + $0x2c0] sm:$0xf] }
 0x178   : > { %v3500_v19 = vld [vmem:[%s4300_s28 + $0x2cc] sm:$0xf0]  ;;  %v3069_v20 = vor.u32 %v3464_v17, %v3068_v15  ;;  %v3340_v22 = vld [vmem:[%s4300_s28 + $0x3c0] sm:$0xf] }
 0x179   : > { %v3213_v21 = vor.u32 %v3500_v19, %v3212_v18  ;;  %v3532_v23 = vld [vmem:[%s4300_s28 + $0x3cc] sm:$0xf0]  ;;  %v2924_v25 = vld [vmem:[%s4300_s28 + $0x80] sm:$0xf] }
 0x17a   : > { %1808 = vmatpush.bf16.msra.mxu2 %v3229_v10  ;;  %1827 = vmatpush.bf16.msra.mxu3 %v3357_v12  ;;  %v3341_v24 = vor.u32 %v3532_v23, %v3340_v22  ;;  %v3428_v26 = vld [vmem:[%s4300_s28 + $0x8c] sm:$0xf0]  ;;  %v3052_v27 = vld [vmem:[%s4300_s28 + $0x180] sm:$0xf] }
 0x17b   : > { %1770 = vmatpush.bf16.msra.mxu0 %v2973_v62  ;;  %1789 = vmatpush.bf16.msra.mxu1 %v3101_v0  ;;  %v2925_v28 = vor.u32 %v3428_v26, %v2924_v25  ;;  %v3460_v29 = vld [vmem:[%s4300_s28 + $0x18c] sm:$0xf0]  ;;  %v3196_v31 = vld [vmem:[%s4300_s28 + $0x2a0] sm:$0xf] }
 0x17c   : > { %v3053_v30 = vor.u32 %v3460_v29, %v3052_v27  ;;  %v3496_v32 = vld [vmem:[%s4300_s28 + $0x2ac] sm:$0xf0]  ;;  %v3324_v33 = vld [vmem:[%s4300_s28 + $0x3a0] sm:$0xf] }
 0x17d   : > { %v3197_v34 = vor.u32 %v3496_v32, %v3196_v31  ;;  %v3528_v35 = vld [vmem:[%s4300_s28 + $0x3ac] sm:$0xf0]  ;;  %v2908_v39 = vld [vmem:[%s4300_s28 + $0x60] sm:$0xf]  ;;  %v3438_v32 = vld [vmem:[%s4300_s28 + $0xe4] sm:$0xf] }
 0x17e   : > { %1809 = vmatpush.bf16.msra.mxu2 %v3213_v21  ;;  %1828 = vmatpush.bf16.msra.mxu3 %v3341_v24  ;;  %v3325_v38 = vor.u32 %v3528_v35, %v3324_v33  ;;  %v3424_v40 = vld [vmem:[%s4300_s28 + $0x6c] sm:$0xf0]  ;;  %v3036_v41 = vld [vmem:[%s4300_s28 + $0x160] sm:$0xf]  ;;  %v2974_v33 = vld [vmem:[%s4300_s28 + $0xf0] sm:$0xf0] }
 0x17f   : > { %1771 = vmatpush.bf16.msra.mxu0 %v2957_v4  ;;  %1790 = vmatpush.bf16.msra.mxu1 %v3085_v6  ;;  %v2909_v42 = vor.u32 %v3424_v40, %v2908_v39  ;;  %v3456_v43 = vld [vmem:[%s4300_s28 + $0x16c] sm:$0xf0]  ;;  %v3180_v46 = vld [vmem:[%s4300_s28 + $0x280] sm:$0xf]  ;;  %v2977_v35 = vor.u32 %v3438_v32, %v2974_v33  ;;  %v3326_v32 = vld [vmem:[%s4300_s28 + $0x3b0] sm:$0xf0] }
 0x180   : > { %v3037_v45 = vor.u32 %v3456_v43, %v3036_v41  ;;  %v3492_v47 = vld [vmem:[%s4300_s28 + $0x28c] sm:$0xf0]  ;;  %v3308_v49 = vld [vmem:[%s4300_s28 + $0x380] sm:$0xf] }
 0x181   : > { %v3181_v48 = vor.u32 %v3492_v47, %v3180_v46  ;;  %v3524_v50 = vld [vmem:[%s4300_s28 + $0x38c] sm:$0xf0]  ;;  %v3020_v54 = vld [vmem:[%s4300_s28 + $0x140] sm:$0xf]  ;;  %v3434_v47 = vld [vmem:[%s4300_s28 + $0xc4] sm:$0xf] }
 0x182   : > { %1810 = vmatpush.bf16.msra.mxu2 %v3197_v34  ;;  %1829 = vmatpush.bf16.msra.mxu3 %v3325_v38  ;;  %v3309_v51 = vor.u32 %v3524_v50, %v3308_v49  ;;  %v3420_v53 = vld [vmem:[%s4300_s28 + $0x4c] sm:$0xf0]  ;;  %v3292_v60 = vld [vmem:[%s4300_s28 + $0x360] sm:$0xf]  ;;  %v3470_v34 = vld [vmem:[%s4300_s28 + $0x1e4] sm:$0xf] }
 0x183   : > { %1772 = vmatpush.bf16.msra.mxu0 %v2941_v16  ;;  %1791 = vmatpush.bf16.msra.mxu1 %v3069_v20  ;;  %v3452_v56 = vld [vmem:[%s4300_s28 + $0x14c] sm:$0xf0]  ;;  %v2876_v4 = vld [vmem:[%s4300_s28 + $0x20] sm:$0xf]  ;;  %v3102_v38 = vld [vmem:[%s4300_s28 + $0x1f0] sm:$0xf0] }
 0x184   : > { %2843 = vmatmul.msk.bf16.gmra.mxu0 %vm732_vm3, %v717_v52  ;;  %2845 = vmatmul.msk.bf16.gmra.mxu1 %vm732_vm3, %v717_v52  ;;  %v3021_v57 = vor.u32 %v3452_v56, %v3020_v54  ;;  %v3488_v59 = vld [vmem:[%s4300_s28 + $0x26c] sm:$0xf0]  ;;  %v3004_v7 = vld [vmem:[%s4300_s28 + $0x120] sm:$0xf]  ;;  %v3105_v39 = vor.u32 %v3470_v34, %v3102_v38  ;;  %v3466_v49 = vld [vmem:[%s4300_s28 + $0x1c4] sm:$0xf] }
 0x185   : > { %2847 = vmatmul.msk.bf16.gmra.mxu2 %vm732_vm3, %v717_v52  ;;  %2849 = vmatmul.msk.bf16.gmra.mxu3 %vm732_vm3, %v717_v52  ;;  %v2892_v52 = vld [vmem:[%s4300_s28 + $0x40] sm:$0xf]  ;;  %v3520_v0 = vld [vmem:[%s4300_s28 + $0x36c] sm:$0xf0]  ;;  %v3230_v54 = vld [vmem:[%s4300_s28 + $0x2f0] sm:$0xf0] }
 0x186   : > { %1811 = vmatpush.bf16.msra.mxu2 %v3181_v48  ;;  %1830 = vmatpush.bf16.msra.mxu3 %v3309_v51  ;;  %v3293_v3 = vor.u32 %v3520_v0, %v3292_v60  ;;  %v3416_v5 = vld [vmem:[%s4300_s28 + $0x2c] sm:$0xf0]  ;;  %v3148_v10 = vld [vmem:[%s4300_s28 + $0x240] sm:$0xf]  ;;  %v2958_v48 = vld [vmem:[%s4300_s28 + $0xd0] sm:$0xf0] }
 0x187   : > { %1773 = vmatpush.bf16.msra.mxu0 %v2925_v28  ;;  %1792 = vmatpush.bf16.msra.mxu1 %v3053_v30  ;;  %v2877_v6 = vor.u32 %v3416_v5, %v2876_v4  ;;  %v3448_v8 = vld [vmem:[%s4300_s28 + $0x12c] sm:$0xf0]  ;;  %v3276_v12 = vld [vmem:[%s4300_s28 + $0x340] sm:$0xf]  ;;  %v2961_v50 = vor.u32 %v3434_v47, %v2958_v48  ;;  %v3086_v51 = vld [vmem:[%s4300_s28 + $0x1d0] sm:$0xf0] }
 0x188   : > { %v3005_v9 = vor.u32 %v3448_v8, %v3004_v7  ;;  %v3484_v11 = vld [vmem:[%s4300_s28 + $0x24c] sm:$0xf0]  ;;  %v2860_v16 = vld [vmem:[%s4300_s28] sm:$0xf]  ;;  %v2942_v4 = vld [vmem:[%s4300_s28 + $0xb0] sm:$0xf0] }
 0x189   : > { %v3149_v13 = vor.u32 %v3484_v11, %v3148_v10  ;;  %v3516_v14 = vld [vmem:[%s4300_s28 + $0x34c] sm:$0xf0]  ;;  %v2988_v18 = vld [vmem:[%s4300_s28 + $0x100] sm:$0xf]  ;;  %v3462_v5 = vld [vmem:[%s4300_s28 + $0x1a4] sm:$0xf] }
 0x18a   : > { %1831 = vmatpush.bf16.msra.mxu3 %v3293_v3  ;;  %v3277_v15 = vor.u32 %v3516_v14, %v3276_v12  ;;  %v3412_v17 = vld [vmem:[%s4300_s28 + $0xc] sm:$0xf0]  ;;  %v3132_v22 = vld [vmem:[%s4300_s28 + $0x220] sm:$0xf]  ;;  %v3430_v3 = vld [vmem:[%s4300_s28 + $0xa4] sm:$0xf] }
 0x18b   : > { %1774 = vmatpush.bf16.msra.mxu0 %v2909_v42  ;;  %1793 = vmatpush.bf16.msra.mxu1 %v3037_v45  ;;  %v2861_v19 = vor.u32 %v3412_v17, %v2860_v16  ;;  %v3444_v20 = vld [vmem:[%s4300_s28 + $0x10c] sm:$0xf0]  ;;  %v3260_v24 = vld [vmem:[%s4300_s28 + $0x320] sm:$0xf]  ;;  %v3070_v7 = vld [vmem:[%s4300_s28 + $0x1b0] sm:$0xf0] }
 0x18c   : > { %v2989_v21 = vor.u32 %v3444_v20, %v2988_v18  ;;  %v3480_v23 = vld [vmem:[%s4300_s28 + $0x22c] sm:$0xf0]  ;;  %v3116_v40 = vld [vmem:[%s4300_s28 + $0x200] sm:$0xf]  ;;  %v3073_v8 = vor.u32 %v3462_v5, %v3070_v7  ;;  %v3214_v10 = vld [vmem:[%s4300_s28 + $0x2d0] sm:$0xf0] }
 0x18d   : > { %v3133_v27 = vor.u32 %v3480_v23, %v3132_v22  ;;  %v3512_v28 = vld [vmem:[%s4300_s28 + $0x32c] sm:$0xf0]  ;;  %v3244_v42 = vld [vmem:[%s4300_s28 + $0x300] sm:$0xf]  ;;  %v3530_v11 = vld [vmem:[%s4300_s28 + $0x3c4] sm:$0xf] }
 0x18e   : > { %1832 = vmatpush.bf16.msra.mxu3 %v3277_v15  ;;  %v3261_v31 = vor.u32 %v3512_v28, %v3260_v24  ;;  %v3476_v41 = vld [vmem:[%s4300_s28 + $0x20c] sm:$0xf0]  ;;  %v3426_v15 = vld [vmem:[%s4300_s28 + $0x84] sm:$0xf]  ;;  %v2926_v16 = vld [vmem:[%s4300_s28 + $0x90] sm:$0xf0] }
 0x18f   : > { %1794 = vmatpush.bf16.msra.mxu1 %v3021_v57  ;;  %v3117_v43 = vor.u32 %v3476_v41, %v3116_v40  ;;  %v3508_v45 = vld [vmem:[%s4300_s28 + $0x30c] sm:$0xf0]  ;;  %v3458_v17 = vld [vmem:[%s4300_s28 + $0x184] sm:$0xf]  ;;  %v2929_v18 = vor.u32 %v3426_v15, %v2926_v16  ;;  %v3198_v22 = vld [vmem:[%s4300_s28 + $0x2b0] sm:$0xf0] }
 0x190   : > { %v3245_v46 = vor.u32 %v3508_v45, %v3244_v42  ;;  %v3526_v23 = vld [vmem:[%s4300_s28 + $0x3a4] sm:$0xf]  ;;  %v936_v28 = vld [vmem:[%s621_s10] sm:$0xf]  ;;  %v3038_v42 = vld [vmem:[%s4300_s28 + $0x170] sm:$0xf0] }
 0x191   : > { %v3422_v38 = vld [vmem:[%s4300_s28 + $0x64] sm:$0xf] }
 0x192   : > { %1833 = vmatpush.bf16.msra.mxu3 %v3261_v31  ;;  %v3454_v40 = vld [vmem:[%s4300_s28 + $0x164] sm:$0xf] }
 0x193   : > { %1795 = vmatpush.bf16.msra.mxu1 %v3005_v9  ;;  %v3498_v9 = vld [vmem:[%s4300_s28 + $0x2c4] sm:$0xf] }
 0x194   : > { %2850 = vmatmul.msk.bf16.vlgmr.msrb.gmra.mxu0 %vm838_vm5, %v710_v55  ;;  %2852 = vmatmul.msk.bf16.vlgmr.msrb.gmra.mxu1 %vm838_vm5, %v710_v55  ;;  %v3217_v12 = vor.u32 %v3498_v9, %v3214_v10  ;;  %v3490_v45 = vld [vmem:[%s4300_s28 + $0x284] sm:$0xf]  ;;  %v4521_v10 = vperm.slane %v936_v28, 3 }
 0x195   : > { %2854 = vmatmul.msk.bf16.vlgmr.msrb.gmra.mxu2 %vm838_vm5, %v710_v55  ;;  %2856 = vmatmul.msk.bf16.vlgmr.msrb.gmra.mxu3 %vm838_vm5, %v710_v55  ;;  %v2893_v55 = vor.u32 %v3420_v53, %v2892_v52  ;;  %v3089_v52 = vor.u32 %v3466_v49, %v3086_v51  ;;  %v3502_v53 = vld [vmem:[%s4300_s28 + $0x2e4] sm:$0xf]  ;;  %v4505_v49 = vperm.slane %v936_v28, 0 }
 0x196   : > { %1834 = vmatpush.bf16.msra.mxu3 %v3245_v46  ;;  %v3182_v46 = vld [vmem:[%s4300_s28 + $0x290] sm:$0xf0]  ;;  %v3522_v47 = vld [vmem:[%s4300_s28 + $0x384] sm:$0xf] }
 0x197   : > { %1775 = vmatpush.bf16.msra.mxu0 %v2893_v55  ;;  %1796 = vmatpush.bf16.msra.mxu1 %v2989_v21  ;;  %v3534_v55 = vld [vmem:[%s4300_s28 + $0x3e4] sm:$0xf]  ;;  %v3185_v51 = vor.u32 %v3490_v45, %v3182_v46  ;;  %v2990_v45 = vld [vmem:[%s4300_s28 + $0x110] sm:$0xf0] }
 0x198   : > { %v3494_v21 = vld [vmem:[%s4300_s28 + $0x2a4] sm:$0xf] }
 0x199   : > { %v3201_v31 = vor.u32 %v3494_v21, %v3198_v22  ;;  %v3486_v5 = vld [vmem:[%s4300_s28 + $0x264] sm:$0xf] }
 0x19a   : > { %v3518_v7 = vld [vmem:[%s4300_s28 + $0x364] sm:$0xf] }
 0x19b   : > { %1776 = vmatpush.bf16.msra.mxu0 %v2877_v6  ;;  %1865 = vmatpush.bf16.msrb.mxu1 %v3105_v39  ;;  %v2945_v6 = vor.u32 %v3430_v3, %v2942_v4  ;;  %v2910_v39 = vld [vmem:[%s4300_s28 + $0x70] sm:$0xf0]  ;;  %v3446_v21 = vld [vmem:[%s4300_s28 + $0x124] sm:$0xf] }
 0x19c   : > { %v2913_v41 = vor.u32 %v3422_v38, %v2910_v39  ;;  %v3022_v3 = vld [vmem:[%s4300_s28 + $0x150] sm:$0xf0] }
 0x19d   : > { %v3278_v38 = vld [vmem:[%s4300_s28 + $0x350] sm:$0xf0] }
 0x19f   : > { %1777 = vmatpush.bf16.msra.mxu0 %v2861_v19  ;;  %1866 = vmatpush.bf16.msrb.mxu1 %v3089_v52  ;;  %v3054_v19 = vld [vmem:[%s4300_s28 + $0x190] sm:$0xf0] }
 0x1a0   : > { %v3057_v20 = vor.u32 %v3458_v17, %v3054_v19  ;;  %v3310_v52 = vld [vmem:[%s4300_s28 + $0x390] sm:$0xf0]  ;;  %v3414_v19 = vld [vmem:[%s4300_s28 + $0x24] sm:$0xf] }
 0x1a3   : > { %1846 = vmatpush.bf16.msrb.mxu0 %v2977_v35  ;;  %1867 = vmatpush.bf16.msrb.mxu1 %v3073_v8  ;;  %v3329_v35 = vor.u32 %v3526_v23, %v3326_v32 }
 0x1a4   : > { %2851 = vmatmul.msk.bf16.gmra.mxu0 %vm838_vm5, %v711_v58  ;;  %2853 = vmatmul.msk.bf16.gmra.mxu1 %vm838_vm5, %v711_v58 }
 0x1a5   : > { %2855 = vmatmul.msk.bf16.gmra.mxu2 %vm838_vm5, %v711_v58  ;;  %2857 = vmatmul.msk.bf16.gmra.mxu3 %vm838_vm5, %v711_v58  ;;  %v3164_v58 = vld [vmem:[%s4300_s28 + $0x260] sm:$0xf] }
 0x1a6   : > { %v3165_v63 = vor.u32 %v3488_v59, %v3164_v58  ;;  %v3233_v58 = vor.u32 %v3502_v53, %v3230_v54  ;;  %v3358_v59 = vld [vmem:[%s4300_s28 + $0x3f0] sm:$0xf0]  ;;  %v3313_v54 = vor.u32 %v3522_v47, %v3310_v52  ;;  %v3478_v52 = vld [vmem:[%s4300_s28 + $0x224] sm:$0xf] }
 0x1a7   : > { %1847 = vmatpush.bf16.msrb.mxu0 %v2961_v50  ;;  %v3361_v0 = vor.u32 %v3534_v55, %v3358_v59  ;;  %1868 = vmatpush.bf16.msrb.mxu1 %v3057_v20  ;;  %v4507_v50 = vperm.slane %v936_v28, 1  ;;  %v3418_v55 = vld [vmem:[%s4300_s28 + $0x44] sm:$0xf]  ;;  %v2878_v20 = vld [vmem:[%s4300_s28 + $0x30] sm:$0xf0] }
 0x1a8   : > { %1812 = vmatpush.bf16.msra.mxu2 %v3165_v63  ;;  %v3450_v59 = vld [vmem:[%s4300_s28 + $0x144] sm:$0xf] }
 0x1a9   : > { %1903 = vmatpush.bf16.msrb.mxu3 %v3361_v0  ;;  %v4514_v0 = vperm.slane %v936_v28, 2  ;;  %v3025_v4 = vor.u32 %v3450_v59, %v3022_v3  ;;  %v2881_v28 = vor.u32 %v3414_v19, %v2878_v20  ;;  %v3262_v59 = vld [vmem:[%s4300_s28 + $0x330] sm:$0xf0] }
 0x1ab   : > { %1848 = vmatpush.bf16.msrb.mxu0 %v2945_v6  ;;  %v3166_v6 = vld [vmem:[%s4300_s28 + $0x270] sm:$0xf0] }
 0x1ac   : > { %1813 = vmatpush.bf16.msra.mxu2 %v3149_v13  ;;  %v3342_v13 = vld [vmem:[%s4300_s28 + $0x3d0] sm:$0xf0] }
 0x1ad   : > { %v3345_v14 = vor.u32 %v3530_v11, %v3342_v13  ;;  %v3169_v11 = vor.u32 %v3486_v5, %v3166_v6 }
 0x1af   : > { %1904 = vmatpush.bf16.msrb.mxu3 %v3345_v14  ;;  %1849 = vmatpush.bf16.msrb.mxu0 %v2929_v18 }
 0x1b0   : > { %1814 = vmatpush.bf16.msra.mxu2 %v3133_v27 }
 0x1b3   : > { %1905 = vmatpush.bf16.msrb.mxu3 %v3329_v35  ;;  %1850 = vmatpush.bf16.msrb.mxu0 %v2913_v41  ;;  %v3514_v35 = vld [vmem:[%s4300_s28 + $0x344] sm:$0xf] }
 0x1b4   : > { %1815 = vmatpush.bf16.msra.mxu2 %v3117_v43  ;;  %v3041_v43 = vor.u32 %v3454_v40, %v3038_v42  ;;  %v3281_v41 = vor.u32 %v3514_v35, %v3278_v38  ;;  %v2862_v42 = vld [vmem:[%s4300_s28 + $0x10] sm:$0xf0] }
 0x1b6   : > { %1869 = vmatpush.bf16.msrb.mxu1 %v3041_v43  ;;  %v3442_v43 = vld [vmem:[%s4300_s28 + $0x104] sm:$0xf] }
 0x1b7   : > { %1906 = vmatpush.bf16.msrb.mxu3 %v3313_v54 }
 0x1b8   : > { %1884 = vmatpush.bf16.msrb.mxu2 %v3233_v58  ;;  %v2894_v58 = vld [vmem:[%s4300_s28 + $0x50] sm:$0xf0] }
 0x1ba   : > { %1870 = vmatpush.bf16.msrb.mxu1 %v3025_v4 }
 0x1bc   : > { %1885 = vmatpush.bf16.msrb.mxu2 %v3217_v12  ;;  %v3294_v12 = vld [vmem:[%s4300_s28 + $0x370] sm:$0xf0] }
 0x1bd   : > { %v3297_v18 = vor.u32 %v3518_v7, %v3294_v12 }
 0x1bf   : > { %1907 = vmatpush.bf16.msrb.mxu3 %v3297_v18  ;;  %v3473_v18 = vld [vmem:[%s4300_s28 + $0x1f4] sm:$0xf0] }
 0x1c0   : > { %1886 = vmatpush.bf16.msrb.mxu2 %v3201_v31  ;;  %v3150_v31 = vld [vmem:[%s4300_s28 + $0x250] sm:$0xf0] }
 0x1c3   : > { %1908 = vmatpush.bf16.msrb.mxu3 %v3281_v41  ;;  %v3236_v41 = vld [vmem:[%s4300_s28 + $0x2e8] sm:$0xf] }
 0x1c4   : > { %1887 = vmatpush.bf16.msrb.mxu2 %v3185_v51  ;;  %v2993_v51 = vor.u32 %v3442_v43, %v2990_v45  ;;  %v3364_v43 = vld [vmem:[%s4300_s28 + $0x3e8] sm:$0xf] }
 0x1c8   : > { %1888 = vmatpush.bf16.msrb.mxu2 %v3169_v11 }
 0x1f1   : > { %v4396_v36 = vpop.f32.mrf.mxu0  ;;  %v4398_v37 = vpop.f32.mrf.mxu1 }
 0x1f8   : > { %v4415_v61 = vpop.f32.mrf.mxu2  ;;  %v4417_v62 = vpop.f32.mrf.mxu3 }
 0x1f9   : > { %v4420_v1 = vpop.f32.mrf.mxu0  ;;  %v4422_v2 = vpop.f32.mrf.mxu1 }
 0x200   : > { %v4439_v25 = vpop.f32.mrf.mxu2  ;;  %v4441_v26 = vpop.f32.mrf.mxu3 }
 0x201   : > { %v4444_v29 = vpop.f32.mrf.mxu0  ;;  %v4446_v30 = vpop.f32.mrf.mxu1 }
 0x208   : > { %v4463_v56 = vpop.f32.mrf.mxu2  ;;  %v4465_v57 = vpop.f32.mrf.mxu3 }
 0x209   : > { %v4468_v60 = vpop.f32.mrf.mxu0  ;;  %v4470_v63 = vpop.f32.mrf.mxu1 }
 0x210   : > { %v4487_v24 = vpop.f32.mrf.mxu2  ;;  %v4489_v27 = vpop.f32.mrf.mxu3 }
 0x211   : > { %v869_v33 = vpop.f32.mrf.mxu0  ;;  %v888_v34 = vpop.f32.mrf.mxu1 }
 0x212   : > { %v870_v48 = vadd.f32 %v869_v33, %v4396_v36  ;;  %v889_v53 = vadd.f32 %v888_v34, %v4398_v37  ;;  %v2897_v36 = vor.u32 %v3418_v55, %v2894_v58  ;;  %v3510_v58 = vld [vmem:[%s4300_s28 + $0x324] sm:$0xf] }
 0x213   : > { %v3265_v3 = vor.u32 %v3510_v58, %v3262_v59  ;;  %v2948_v58 = vld [vmem:[%s4300_s28 + $0xa8] sm:$0xf]  ;;  %v3433_v59 = vld [vmem:[%s4300_s28 + $0xb4] sm:$0xf0] }
 0x214   : > { %v946_v37 = vadd.f32 %v4505_v49, %v870_v48  ;;  %1851 = vmatpush.bf16.msrb.mxu0 %v2897_v36  ;;  %v947_v13 = vadd.f32 %v4507_v50, %v889_v53  ;;  %v3134_v53 = vld [vmem:[%s4300_s28 + $0x230] sm:$0xf0] }
 0x215   : > { %v3137_v36 = vor.u32 %v3478_v52, %v3134_v53  ;;  %1909 = vmatpush.bf16.msrb.mxu3 %v3265_v3 }
 0x216   : > { %v962_v46 = vmax.f32 %v946_v37, 0.0  ;;  %v963_v47 = vmax.f32 %v947_v13, 0.0 }
 0x218   : > { %v907_v8 = vpop.f32.mrf.mxu2  ;;  %v926_v9 = vpop.f32.mrf.mxu3  ;;  %1852 = vmatpush.bf16.msrb.mxu0 %v2881_v28  ;;  %v2964_v28 = vld [vmem:[%s4300_s28 + $0xc8] sm:$0xf] }
 0x219   : > { %v908_v14 = vadd.f32 %v907_v8, %v4415_v61  ;;  %v927_v15 = vadd.f32 %v926_v9, %v4417_v62  ;;  %v871_v16 = vpop.f32.mrf.mxu0  ;;  %v890_v17 = vpop.f32.mrf.mxu1  ;;  %v3006_v61 = vld [vmem:[%s4300_s28 + $0x130] sm:$0xf0]  ;;  %v3482_v62 = vld [vmem:[%s4300_s28 + $0x244] sm:$0xf] }
 0x21a   : > { %v872_v22 = vadd.f32 %v871_v16, %v4420_v1  ;;  %v891_v23 = vadd.f32 %v890_v17, %v4422_v2  ;;  %v3009_v33 = vor.u32 %v3446_v21, %v3006_v61  ;;  %v3153_v34 = vor.u32 %v3482_v62, %v3150_v31  ;;  %v3410_v1 = vld [vmem:[%s4300_s28 + $0x4] sm:$0xf]  ;;  %v3108_v16 = vld [vmem:[%s4300_s28 + $0x1e8] sm:$0xf] }
 0x21b   : > { %v4536_v32 = vadd.f32 %v4514_v0, %v908_v14  ;;  %v4542_v2 = vadd.f32 %v4521_v10, %v927_v15  ;;  %v2865_v48 = vor.u32 %v3410_v1, %v2862_v42  ;;  %v2980_v14 = vld [vmem:[%s4300_s28 + $0xe8] sm:$0xf]  ;;  %v3441_v15 = vld [vmem:[%s4300_s28 + $0xf4] sm:$0xf0]  ;;  %v3109_v21 = vor.u32 %v3473_v18, %v3108_v16 }
 0x21c   : > { %v950_v39 = vadd.f32 %v4505_v49, %v872_v22  ;;  %v951_v40 = vadd.f32 %v4507_v50, %v891_v23  ;;  %1871 = vmatpush.bf16.msrb.mxu1 %v3009_v33  ;;  %1889 = vmatpush.bf16.msrb.mxu2 %v3153_v34  ;;  %v2981_v17 = vor.u32 %v3441_v15, %v2980_v14  ;;  %v3506_v22 = vld [vmem:[%s4300_s28 + $0x304] sm:$0xf]  ;;  %v3246_v23 = vld [vmem:[%s4300_s28 + $0x310] sm:$0xf0]  ;;  %v3092_v33 = vld [vmem:[%s4300_s28 + $0x1c8] sm:$0xf] }
 0x21d   : > { %v964_v4 = vmax.f32 %v4536_v32, 0.0  ;;  %v965_v5 = vmax.f32 %v4542_v2, 0.0  ;;  %1853 = vmatpush.bf16.msrb.mxu0 %v2865_v48  ;;  %v3249_v31 = vor.u32 %v3506_v22, %v3246_v23  ;;  %v3437_v32 = vld [vmem:[%s4300_s28 + $0xd4] sm:$0xf0]  ;;  %v2932_v14 = vld [vmem:[%s4300_s28 + $0x88] sm:$0xf] }
 0x21e   : > { %v966_v54 = vmax.f32 %v950_v39, 0.0  ;;  %v967_v55 = vmax.f32 %v951_v40, 0.0  ;;  %v3469_v34 = vld [vmem:[%s4300_s28 + $0x1d4] sm:$0xf0]  ;;  %v2965_v2 = vor.u32 %v3437_v32, %v2964_v28  ;;  %v3060_v18 = vld [vmem:[%s4300_s28 + $0x188] sm:$0xf] }
 0x21f   : > { %v3093_v39 = vor.u32 %v3469_v34, %v3092_v33  ;;  %1910 = vmatpush.bf16.msrb.mxu3 %v3249_v31  ;;  %v3505_v42 = vld [vmem:[%s4300_s28 + $0x2f4] sm:$0xf0]  ;;  %v3204_v22 = vld [vmem:[%s4300_s28 + $0x2a8] sm:$0xf] }
 0x220   : > { %v4555_v6 = vpack.c.bf16 %v966_v54, %v962_v46  ;;  %v4557_v7 = vpack.c.bf16 %v967_v55, %v963_v47  ;;  %v909_v37 = vpop.f32.mrf.mxu2  ;;  %v928_v8 = vpop.f32.mrf.mxu3  ;;  %1872 = vmatpush.bf16.msrb.mxu1 %v2993_v51  ;;  %1890 = vmatpush.bf16.msrb.mxu2 %v3137_v36  ;;  %v3237_v47 = vor.u32 %v3505_v42, %v3236_v41  ;;  %v3537_v48 = vld [vmem:[%s4300_s28 + $0x3f4] sm:$0xf0]  ;;  %v3076_v36 = vld [vmem:[%s4300_s28 + $0x1a8] sm:$0xf] }
 0x221   : > { %v910_v9 = vadd.f32 %v909_v37, %v4439_v25  ;;  %v929_v11 = vadd.f32 %v928_v8, %v4441_v26  ;;  %v874_v12 = vpop.f32.mrf.mxu0  ;;  %v893_v13 = vpop.f32.mrf.mxu1  ;;  %v3474_v25 = vld [vmem:[%s4300_s28 + $0x204] sm:$0xf]  ;;  %v3118_v26 = vld [vmem:[%s4300_s28 + $0x210] sm:$0xf0]  ;;  %v3365_v55 = vor.u32 %v3537_v48, %v3364_v43  ;;  %v3220_v37 = vld [vmem:[%s4300_s28 + $0x2c8] sm:$0xf] }
 0x222   : > { %1778 = vmatmul.bf16.vlgmr.msra.gmra.mxu0 %v4555_v6  ;;  %1797 = vmatmul.bf16.vlgmr.msra.gmra.mxu1 %v4557_v7  ;;  %v875_v61 = vadd.f32 %v874_v12, %v4444_v29  ;;  %v3121_v62 = vor.u32 %v3474_v25, %v3118_v26  ;;  %v894_v1 = vadd.f32 %v893_v13, %v4446_v30  ;;  %v3501_v8 = vld [vmem:[%s4300_s28 + $0x2d4] sm:$0xf0]  ;;  %v3348_v12 = vld [vmem:[%s4300_s28 + $0x3c8] sm:$0xf] }
 0x223   : > { %v952_v19 = vadd.f32 %v4514_v0, %v910_v9  ;;  %v953_v20 = vadd.f32 %v4521_v10, %v929_v11  ;;  %1922 = vmatpush.bf16.msra.mxu0 %v2981_v17  ;;  %v3221_v11 = vor.u32 %v3501_v8, %v3220_v37  ;;  %v3533_v13 = vld [vmem:[%s4300_s28 + $0x3d4] sm:$0xf0]  ;;  %v2916_v41 = vld [vmem:[%s4300_s28 + $0x68] sm:$0xf] }
 0x224   : > { %1941 = vmatpush.bf16.msra.mxu1 %v3109_v21  ;;  %1891 = vmatpush.bf16.msrb.mxu2 %v3121_v62  ;;  %v954_v45 = vadd.f32 %v4505_v49, %v875_v61  ;;  %v955_v51 = vadd.f32 %v4507_v50, %v894_v1  ;;  %v3349_v16 = vor.u32 %v3533_v13, %v3348_v12  ;;  %v3429_v17 = vld [vmem:[%s4300_s28 + $0x94] sm:$0xf0]  ;;  %v3044_v43 = vld [vmem:[%s4300_s28 + $0x168] sm:$0xf] }
 0x225   : > { %v968_v35 = vmax.f32 %v952_v19, 0.0  ;;  %v969_v38 = vmax.f32 %v953_v20, 0.0  ;;  %v3461_v25 = vld [vmem:[%s4300_s28 + $0x194] sm:$0xf0]  ;;  %v2933_v21 = vor.u32 %v3429_v17, %v2932_v14  ;;  %v3172_v8 = vld [vmem:[%s4300_s28 + $0x268] sm:$0xf] }
 0x226   : > { %v970_v26 = vmax.f32 %v954_v45, 0.0  ;;  %v971_v19 = vmax.f32 %v955_v51, 0.0  ;;  %v3497_v23 = vld [vmem:[%s4300_s28 + $0x2b4] sm:$0xf0]  ;;  %v3061_v62 = vor.u32 %v3461_v25, %v3060_v18  ;;  %v3316_v51 = vld [vmem:[%s4300_s28 + $0x388] sm:$0xf] }
 0x227   : > { %v4579_v40 = vpack.c.bf16 %v968_v35, %v964_v4  ;;  %v4581_v29 = vpack.c.bf16 %v969_v38, %v965_v5  ;;  %1923 = vmatpush.bf16.msra.mxu0 %v2965_v2  ;;  %v3465_v5 = vld [vmem:[%s4300_s28 + $0x1b4] sm:$0xf0]  ;;  %v3205_v31 = vor.u32 %v3497_v23, %v3204_v22  ;;  %v3156_v18 = vld [vmem:[%s4300_s28 + $0x248] sm:$0xf] }
 0x228   : > { %v912_v46 = vpop.f32.mrf.mxu2  ;;  %v931_v30 = vpop.f32.mrf.mxu3  ;;  %1942 = vmatpush.bf16.msra.mxu1 %v3093_v39  ;;  %v3077_v9 = vor.u32 %v3465_v5, %v3076_v36  ;;  %v3425_v42 = vld [vmem:[%s4300_s28 + $0x74] sm:$0xf0]  ;;  %v2868_v22 = vld [vmem:[%s4300_s28 + $0x8] sm:$0xf] }
 0x229   : > { %v913_v52 = vadd.f32 %v912_v46, %v4463_v56  ;;  %1816 = vmatmul.bf16.vlgmr.msra.gmra.mxu2 %v4579_v40  ;;  %1835 = vmatmul.bf16.vlgmr.msra.gmra.mxu3 %v4581_v29  ;;  %v876_v53 = vpop.f32.mrf.mxu0  ;;  %v895_v54 = vpop.f32.mrf.mxu1  ;;  %v2949_v56 = vor.u32 %v3433_v59, %v2948_v58  ;;  %v932_v20 = vadd.f32 %v931_v30, %v4465_v57  ;;  %v3457_v46 = vld [vmem:[%s4300_s28 + $0x174] sm:$0xf0]  ;;  %v3188_v30 = vld [vmem:[%s4300_s28 + $0x288] sm:$0xf] }
 0x22a   : > { %v877_v3 = vadd.f32 %v876_v53, %v4468_v60  ;;  %v896_v4 = vadd.f32 %v895_v54, %v4470_v63  ;;  %1960 = vmatpush.bf16.msra.mxu2 %v3237_v47  ;;  %1979 = vmatpush.bf16.msra.mxu3 %v3365_v55  ;;  %v2917_v45 = vor.u32 %v3425_v42, %v2916_v41  ;;  %v3493_v47 = vld [vmem:[%s4300_s28 + $0x294] sm:$0xf0]  ;;  %v2900_v53 = vld [vmem:[%s4300_s28 + $0x48] sm:$0xf]  ;;  %v3471_v41 = vld [vmem:[%s4300_s28 + $0x1ec] sm:$0xf] }
 0x22b   : > { %v956_v60 = vadd.f32 %v4514_v0, %v913_v52  ;;  %1924 = vmatpush.bf16.msra.mxu0 %v2949_v56  ;;  %v957_v1 = vadd.f32 %v4521_v10, %v932_v20  ;;  %v3045_v48 = vor.u32 %v3457_v46, %v3044_v43  ;;  %v3525_v52 = vld [vmem:[%s4300_s28 + $0x394] sm:$0xf0]  ;;  %v3189_v54 = vor.u32 %v3493_v47, %v3188_v30  ;;  %v3028_v59 = vld [vmem:[%s4300_s28 + $0x148] sm:$0xf]  ;;  %v3110_v43 = vld [vmem:[%s4300_s28 + $0x1f8] sm:$0xf0] }
 0x22c   : > { %v958_v63 = vadd.f32 %v4505_v49, %v877_v3  ;;  %v959_v15 = vadd.f32 %v4507_v50, %v896_v4  ;;  %1943 = vmatpush.bf16.msra.mxu1 %v3077_v9  ;;  %v3332_v49 = vld [vmem:[%s4300_s28 + $0x3a8] sm:$0xf]  ;;  %v3529_v50 = vld [vmem:[%s4300_s28 + $0x3b4] sm:$0xf0]  ;;  %v3317_v55 = vor.u32 %v3525_v52, %v3316_v51  ;;  %v3113_v30 = vor.u32 %v3471_v41, %v3110_v43  ;;  %v2966_v52 = vld [vmem:[%s4300_s28 + $0xd8] sm:$0xf0] }
 0x22d   : > { %v972_v32 = vmax.f32 %v956_v60, 0.0  ;;  %v3333_v38 = vor.u32 %v3529_v50, %v3332_v49  ;;  %v3421_v58 = vld [vmem:[%s4300_s28 + $0x54] sm:$0xf0]  ;;  %v2884_v60 = vld [vmem:[%s4300_s28 + $0x28] sm:$0xf] }
 0x22e   : > { %v974_v28 = vmax.f32 %v958_v63, 0.0  ;;  %v975_v61 = vmax.f32 %v959_v15, 0.0  ;;  %1961 = vmatpush.bf16.msra.mxu2 %v3221_v11  ;;  %1980 = vmatpush.bf16.msra.mxu3 %v3349_v16  ;;  %v3453_v36 = vld [vmem:[%s4300_s28 + $0x154] sm:$0xf0]  ;;  %v2901_v4 = vor.u32 %v3421_v58, %v2900_v53  ;;  %v3300_v11 = vld [vmem:[%s4300_s28 + $0x368] sm:$0xf] }
 0x22f   : > { %1925 = vmatpush.bf16.msra.mxu0 %v2933_v21  ;;  %v3029_v37 = vor.u32 %v3453_v36, %v3028_v59  ;;  %v3489_v9 = vld [vmem:[%s4300_s28 + $0x274] sm:$0xf0]  ;;  %v3012_v15 = vld [vmem:[%s4300_s28 + $0x128] sm:$0xf]  ;;  %v3467_v53 = vld [vmem:[%s4300_s28 + $0x1cc] sm:$0xf] }
 0x230   : > { %v4614_v33 = vpack.c.bf16 %v974_v28, %v970_v26  ;;  %v4616_v57 = vpack.c.bf16 %v975_v61, %v971_v19  ;;  %v914_v34 = vpop.f32.mrf.mxu2  ;;  %v933_v35 = vpop.f32.mrf.mxu3  ;;  %1944 = vmatpush.bf16.msra.mxu1 %v3061_v62  ;;  %v3173_v12 = vor.u32 %v3489_v9, %v3172_v8  ;;  %v3521_v13 = vld [vmem:[%s4300_s28 + $0x374] sm:$0xf0]  ;;  %v3284_v20 = vld [vmem:[%s4300_s28 + $0x348] sm:$0xf]  ;;  %v3503_v59 = vld [vmem:[%s4300_s28 + $0x2ec] sm:$0xf] }
 0x231   : > { %v915_v2 = vadd.f32 %v914_v34, %v4487_v24  ;;  %v934_v39 = vadd.f32 %v933_v35, %v4489_v27  ;;  %v3301_v14 = vor.u32 %v3521_v13, %v3300_v11  ;;  %v3417_v63 = vld [vmem:[%s4300_s28 + $0x34] sm:$0xf0]  ;;  %v2996_v61 = vld [vmem:[%s4300_s28 + $0x108] sm:$0xf]  ;;  %v3238_v36 = vld [vmem:[%s4300_s28 + $0x2f8] sm:$0xf0] }
 0x232   : > { %1783 = vmatmul.bf16.gmra.mxu0 %v4614_v33  ;;  %1802 = vmatmul.bf16.gmra.mxu1 %v4616_v57  ;;  %v2885_v16 = vor.u32 %v3417_v63, %v2884_v60  ;;  %v3449_v17 = vld [vmem:[%s4300_s28 + $0x134] sm:$0xf0]  ;;  %v3140_v62 = vld [vmem:[%s4300_s28 + $0x228] sm:$0xf]  ;;  %v2950_v8 = vld [vmem:[%s4300_s28 + $0xb8] sm:$0xf0] }
 0x233   : > { %v960_v24 = vadd.f32 %v4514_v0, %v915_v2  ;;  %v961_v27 = vadd.f32 %v4521_v10, %v934_v39  ;;  %1962 = vmatpush.bf16.msra.mxu2 %v3205_v31  ;;  %1981 = vmatpush.bf16.msra.mxu3 %v3333_v38  ;;  %v973_v0 = vmax.f32 %v957_v1, 0.0  ;;  %v3485_v25 = vld [vmem:[%s4300_s28 + $0x254] sm:$0xf0]  ;;  %v3013_v26 = vor.u32 %v3449_v17, %v3012_v15  ;;  %v3439_v2 = vld [vmem:[%s4300_s28 + $0xec] sm:$0xf] }
 0x234   : > { %1926 = vmatpush.bf16.msra.mxu0 %v2917_v45  ;;  %1945 = vmatpush.bf16.msra.mxu1 %v3045_v48  ;;  %v3157_v19 = vor.u32 %v3485_v25, %v3156_v18  ;;  %v3517_v21 = vld [vmem:[%s4300_s28 + $0x354] sm:$0xf0]  ;;  %v2982_v39 = vld [vmem:[%s4300_s28 + $0xf8] sm:$0xf0]  ;;  %v3124_v45 = vld [vmem:[%s4300_s28 + $0x208] sm:$0xf] }
 0x235   : > { %v976_v3 = vmax.f32 %v960_v24, 0.0  ;;  %v977_v10 = vmax.f32 %v961_v27, 0.0  ;;  %v3285_v23 = vor.u32 %v3517_v21, %v3284_v20  ;;  %v3413_v28 = vld [vmem:[%s4300_s28 + $0x14] sm:$0xf0]  ;;  %v2985_v42 = vor.u32 %v3439_v2, %v2982_v39  ;;  %v3252_v24 = vld [vmem:[%s4300_s28 + $0x308] sm:$0xf] }
 0x236   : > { %v3445_v49 = vld [vmem:[%s4300_s28 + $0x114] sm:$0xf0]  ;;  %v2869_v50 = vor.u32 %v3413_v28, %v2868_v22  ;;  %v3435_v48 = vld [vmem:[%s4300_s28 + $0xcc] sm:$0xf]  ;;  %v2934_v25 = vld [vmem:[%s4300_s28 + $0x98] sm:$0xf0] }
 0x237   : > { %v4637_v56 = vpack.c.bf16 %v976_v3, %v972_v32  ;;  %v4639_v5 = vpack.c.bf16 %v977_v10, %v973_v0  ;;  %1963 = vmatpush.bf16.msra.mxu2 %v3189_v54  ;;  %1982 = vmatpush.bf16.msra.mxu3 %v3317_v55  ;;  %v3481_v31 = vld [vmem:[%s4300_s28 + $0x234] sm:$0xf0]  ;;  %v3268_v32 = vld [vmem:[%s4300_s28 + $0x328] sm:$0xf]  ;;  %v2997_v35 = vor.u32 %v3445_v49, %v2996_v61  ;;  %v3094_v54 = vld [vmem:[%s4300_s28 + $0x1d8] sm:$0xf0] }
 0x238   : > { %1927 = vmatpush.bf16.msra.mxu0 %v2901_v4  ;;  %1946 = vmatpush.bf16.msra.mxu1 %v3029_v37  ;;  %v3513_v34 = vld [vmem:[%s4300_s28 + $0x334] sm:$0xf0]  ;;  %v3141_v38 = vor.u32 %v3481_v31, %v3140_v62  ;;  %v2969_v55 = vor.u32 %v3435_v48, %v2966_v52  ;;  %v3097_v58 = vor.u32 %v3467_v53, %v3094_v54  ;;  %v3535_v0 = vld [vmem:[%s4300_s28 + $0x3ec] sm:$0xf]  ;;  %v3366_v10 = vld [vmem:[%s4300_s28 + $0x3f8] sm:$0xf0] }
 0x239   : > { %1821 = vmatmul.bf16.gmra.mxu2 %v4637_v56  ;;  %1840 = vmatmul.bf16.gmra.mxu3 %v4639_v5  ;;  %v3269_v1 = vor.u32 %v3513_v34, %v3268_v32  ;;  %v3477_v46 = vld [vmem:[%s4300_s28 + $0x214] sm:$0xf0]  ;;  %v3241_v3 = vor.u32 %v3503_v59, %v3238_v36  ;;  %v3369_v4 = vor.u32 %v3535_v0, %v3366_v10  ;;  %v3431_v37 = vld [vmem:[%s4300_s28 + $0xac] sm:$0xf]  ;;  %v3206_v22 = vld [vmem:[%s4300_s28 + $0x2b8] sm:$0xf0] }
 0x23a   : > { %v3125_v47 = vor.u32 %v3477_v46, %v3124_v45  ;;  %v3509_v27 = vld [vmem:[%s4300_s28 + $0x314] sm:$0xf0]  ;;  %v3463_v9 = vld [vmem:[%s4300_s28 + $0x1ac] sm:$0xf]  ;;  %v2953_v11 = vor.u32 %v3431_v37, %v2950_v8  ;;  %v3334_v28 = vld [vmem:[%s4300_s28 + $0x3b8] sm:$0xf0] }
 0x23b   : > { %1964 = vmatpush.bf16.msra.mxu2 %v3173_v12  ;;  %1983 = vmatpush.bf16.msra.mxu3 %v3301_v14  ;;  %v3253_v51 = vor.u32 %v3509_v27, %v3252_v24  ;;  %v3078_v12 = vld [vmem:[%s4300_s28 + $0x1b8] sm:$0xf0]  ;;  %v3499_v13 = vld [vmem:[%s4300_s28 + $0x2cc] sm:$0xf] }
 0x23c   : > { %1928 = vmatpush.bf16.msra.mxu0 %v2885_v16  ;;  %1947 = vmatpush.bf16.msra.mxu1 %v3013_v26  ;;  %v3222_v14 = vld [vmem:[%s4300_s28 + $0x2d8] sm:$0xf0]  ;;  %v3081_v60 = vor.u32 %v3463_v9, %v3078_v12  ;;  %v3531_v15 = vld [vmem:[%s4300_s28 + $0x3cc] sm:$0xf] }
 0x23d   : > { %v3225_v63 = vor.u32 %v3499_v13, %v3222_v14  ;;  %v3350_v16 = vld [vmem:[%s4300_s28 + $0x3d8] sm:$0xf0]  ;;  %v3427_v17 = vld [vmem:[%s4300_s28 + $0x8c] sm:$0xf] }
 0x23e   : > { %v3353_v18 = vor.u32 %v3531_v15, %v3350_v16  ;;  %v3459_v26 = vld [vmem:[%s4300_s28 + $0x18c] sm:$0xf]  ;;  %v2937_v20 = vor.u32 %v3427_v17, %v2934_v25  ;;  %v2918_v31 = vld [vmem:[%s4300_s28 + $0x78] sm:$0xf0] }
 0x23f   : > { %1965 = vmatpush.bf16.msra.mxu2 %v3157_v19  ;;  %1984 = vmatpush.bf16.msra.mxu3 %v3285_v23  ;;  %v3062_v19 = vld [vmem:[%s4300_s28 + $0x198] sm:$0xf0]  ;;  %v3495_v21 = vld [vmem:[%s4300_s28 + $0x2ac] sm:$0xf] }
 0x240   : > { %1929 = vmatpush.bf16.msra.mxu0 %v2869_v50  ;;  %1948 = vmatpush.bf16.msra.mxu1 %v2997_v35  ;;  %v3527_v23 = vld [vmem:[%s4300_s28 + $0x3ac] sm:$0xf]  ;;  %v3065_v61 = vor.u32 %v3459_v26, %v3062_v19  ;;  %v3209_v49 = vor.u32 %v3495_v21, %v3206_v22  ;;  %v3046_v35 = vld [vmem:[%s4300_s28 + $0x178] sm:$0xf0] }
 0x241   : > { %v3337_v50 = vor.u32 %v3527_v23, %v3334_v28  ;;  %v3423_v62 = vld [vmem:[%s4300_s28 + $0x6c] sm:$0xf]  ;;  %v2902_v46 = vld [vmem:[%s4300_s28 + $0x58] sm:$0xf0] }
 0x242   : > { %1854 = vmatmul.bf16.vlgmr.msrb.gmra.mxu0 %v4555_v6  ;;  %1873 = vmatmul.bf16.vlgmr.msrb.gmra.mxu1 %v4557_v7  ;;  %v3455_v32 = vld [vmem:[%s4300_s28 + $0x16c] sm:$0xf]  ;;  %v2921_v34 = vor.u32 %v3423_v62, %v2918_v31  ;;  %v3302_v54 = vld [vmem:[%s4300_s28 + $0x378] sm:$0xf0] }
 0x243   : > { %1966 = vmatpush.bf16.msra.mxu2 %v3141_v38  ;;  %1985 = vmatpush.bf16.msra.mxu3 %v3269_v1  ;;  %v3491_v38 = vld [vmem:[%s4300_s28 + $0x28c] sm:$0xf]  ;;  %v3190_v1 = vld [vmem:[%s4300_s28 + $0x298] sm:$0xf0]  ;;  %v3049_v2 = vor.u32 %v3455_v32, %v3046_v35 }
 0x244   : > { %1998 = vmatpush.bf16.msrb.mxu0 %v2985_v42  ;;  %2017 = vmatpush.bf16.msrb.mxu1 %v3113_v30  ;;  %v3193_v39 = vor.u32 %v3491_v38, %v3190_v1  ;;  %v3523_v41 = vld [vmem:[%s4300_s28 + $0x38c] sm:$0xf]  ;;  %v3318_v42 = vld [vmem:[%s4300_s28 + $0x398] sm:$0xf0]  ;;  %v978_v38 = vld [vmem:[#allocation4 + $0x30] sm:$0xff] }
 0x245   : > { %v3419_v43 = vld [vmem:[%s4300_s28 + $0x4c] sm:$0xf]  ;;  %v3321_v45 = vor.u32 %v3523_v41, %v3318_v42  ;;  %v2886_v59 = vld [vmem:[%s4300_s28 + $0x38] sm:$0xf0]  ;;  %v982_v41 = vld [vmem:[#allocation4 + $0x50] sm:$0xff] }
 0x246   : > { %v3451_v30 = vld [vmem:[%s4300_s28 + $0x14c] sm:$0xf]  ;;  %v2905_v24 = vor.u32 %v3419_v43, %v2902_v46  ;;  %v2870_v14 = vld [vmem:[%s4300_s28 + $0x18] sm:$0xf0] }
 0x247   : > { %1967 = vmatpush.bf16.msra.mxu2 %v3125_v47  ;;  %1986 = vmatpush.bf16.msra.mxu3 %v3253_v51  ;;  %v3030_v47 = vld [vmem:[%s4300_s28 + $0x158] sm:$0xf0]  ;;  %v3487_v48 = vld [vmem:[%s4300_s28 + $0x26c] sm:$0xf] }
 0x248   : > { %1999 = vmatpush.bf16.msrb.mxu0 %v2969_v55  ;;  %2018 = vmatpush.bf16.msrb.mxu1 %v3097_v58  ;;  %v3033_v27 = vor.u32 %v3451_v30, %v3030_v47  ;;  %v3174_v51 = vld [vmem:[%s4300_s28 + $0x278] sm:$0xf0]  ;;  %v3519_v52 = vld [vmem:[%s4300_s28 + $0x36c] sm:$0xf] }
 0x249   : > { %1892 = vmatmul.bf16.vlgmr.msrb.gmra.mxu2 %v4579_v40  ;;  %1911 = vmatmul.bf16.vlgmr.msrb.gmra.mxu3 %v4581_v29  ;;  %v3177_v53 = vor.u32 %v3487_v48, %v3174_v51  ;;  %v3305_v55 = vor.u32 %v3519_v52, %v3302_v54  ;;  %v3415_v58 = vld [vmem:[%s4300_s28 + $0x2c] sm:$0xf]  ;;  %v3142_v17 = vld [vmem:[%s4300_s28 + $0x238] sm:$0xf0] }
 0x24a   : > { %v3447_v36 = vld [vmem:[%s4300_s28 + $0x12c] sm:$0xf]  ;;  %v2889_v0 = vor.u32 %v3415_v58, %v2886_v59  ;;  %v3270_v25 = vld [vmem:[%s4300_s28 + $0x338] sm:$0xf0] }
 0x24b   : > { %2036 = vmatpush.bf16.msrb.mxu2 %v3241_v3  ;;  %2055 = vmatpush.bf16.msrb.mxu3 %v3369_v4  ;;  %v3014_v3 = vld [vmem:[%s4300_s28 + $0x138] sm:$0xf0]  ;;  %v3483_v10 = vld [vmem:[%s4300_s28 + $0x24c] sm:$0xf] }
 0x24c   : > { %2000 = vmatpush.bf16.msrb.mxu0 %v2953_v11  ;;  %2019 = vmatpush.bf16.msrb.mxu1 %v3081_v60  ;;  %v3158_v4 = vld [vmem:[%s4300_s28 + $0x258] sm:$0xf0]  ;;  %v3017_v37 = vor.u32 %v3447_v36, %v3014_v3  ;;  %v3515_v9 = vld [vmem:[%s4300_s28 + $0x34c] sm:$0xf]  ;;  %v990_v36 = vld [vmem:[#allocation4 + $0x60] sm:$0xff] }
 0x24d   : > { %v3161_v8 = vor.u32 %v3483_v10, %v3158_v4  ;;  %v3286_v11 = vld [vmem:[%s4300_s28 + $0x358] sm:$0xf0]  ;;  %v3411_v12 = vld [vmem:[%s4300_s28 + $0xc] sm:$0xf] }
 0x24e   : > { %v3289_v13 = vor.u32 %v3515_v9, %v3286_v11  ;;  %v3443_v60 = vld [vmem:[%s4300_s28 + $0x10c] sm:$0xf]  ;;  %v2873_v15 = vor.u32 %v3411_v12, %v2870_v14  ;;  %v3126_v22 = vld [vmem:[%s4300_s28 + $0x218] sm:$0xf0]  ;;  %v979_v12 = vld [vmem:[#allocation4] sm:$0xff] }
 0x24f   : > { %2037 = vmatpush.bf16.msrb.mxu2 %v3225_v63  ;;  %2056 = vmatpush.bf16.msrb.mxu3 %v3353_v18  ;;  %v2998_v63 = vld [vmem:[%s4300_s28 + $0x118] sm:$0xf0]  ;;  %v3479_v16 = vld [vmem:[%s4300_s28 + $0x22c] sm:$0xf] }
 0x250   : > { %2001 = vmatpush.bf16.msrb.mxu0 %v2937_v20  ;;  %2020 = vmatpush.bf16.msrb.mxu1 %v3065_v61  ;;  %v3511_v18 = vld [vmem:[%s4300_s28 + $0x32c] sm:$0xf]  ;;  %v3001_v26 = vor.u32 %v3443_v60, %v2998_v63  ;;  %v3145_v19 = vor.u32 %v3479_v16, %v3142_v17  ;;  %v3254_v61 = vld [vmem:[%s4300_s28 + $0x318] sm:$0xf0] }
 0x251   : > { %v3273_v20 = vor.u32 %v3511_v18, %v3270_v25  ;;  %v3475_v21 = vld [vmem:[%s4300_s28 + $0x20c] sm:$0xf] }
 0x252   : > { %1859 = vmatmul.bf16.gmra.mxu0 %v4614_v33  ;;  %1878 = vmatmul.bf16.gmra.mxu1 %v4616_v57  ;;  %v3507_v23 = vld [vmem:[%s4300_s28 + $0x30c] sm:$0xf]  ;;  %v3129_v28 = vor.u32 %v3475_v21, %v3126_v22 }
 0x253   : > { %2038 = vmatpush.bf16.msrb.mxu2 %v3209_v49  ;;  %2057 = vmatpush.bf16.msrb.mxu3 %v3337_v50  ;;  %v3257_v49 = vor.u32 %v3507_v23, %v3254_v61  ;;  %v983_v25 = vld [vmem:[#allocation4 + $0x68] sm:$0xff] }
 0x254   : > { %2002 = vmatpush.bf16.msrb.mxu0 %v2921_v34  ;;  %2021 = vmatpush.bf16.msrb.mxu1 %v3049_v2 }
 0x257   : > { %2039 = vmatpush.bf16.msrb.mxu2 %v3193_v39  ;;  %2058 = vmatpush.bf16.msrb.mxu3 %v3321_v45 }
 0x258   : > { %2003 = vmatpush.bf16.msrb.mxu0 %v2905_v24  ;;  %2022 = vmatpush.bf16.msrb.mxu1 %v3033_v27  ;;  %v986_v27 = vld [vmem:[#allocation4 + $0x40] sm:$0xff] }
 0x259   : > { %1897 = vmatmul.bf16.gmra.mxu2 %v4637_v56  ;;  %1916 = vmatmul.bf16.gmra.mxu3 %v4639_v5 }
 0x25b   : > { %2040 = vmatpush.bf16.msrb.mxu2 %v3177_v53  ;;  %2059 = vmatpush.bf16.msrb.mxu3 %v3305_v55 }
 0x25c   : > { %2004 = vmatpush.bf16.msrb.mxu0 %v2889_v0  ;;  %2023 = vmatpush.bf16.msrb.mxu1 %v3017_v37 }
 0x25f   : > { %2041 = vmatpush.bf16.msrb.mxu2 %v3161_v8  ;;  %2060 = vmatpush.bf16.msrb.mxu3 %v3289_v13 }
 0x260   : > { %2005 = vmatpush.bf16.msrb.mxu0 %v2873_v15  ;;  %2024 = vmatpush.bf16.msrb.mxu1 %v3001_v26 }
 0x262   : > { %1930 = vmatmul.bf16.vlgmr.msra.gmra.mxu0 %v4555_v6  ;;  %1949 = vmatmul.bf16.vlgmr.msra.gmra.mxu1 %v4557_v7 }
 0x263   : > { %2042 = vmatpush.bf16.msrb.mxu2 %v3145_v19  ;;  %2061 = vmatpush.bf16.msrb.mxu3 %v3273_v20 }
 0x267   : > { %2043 = vmatpush.bf16.msrb.mxu2 %v3129_v28  ;;  %2062 = vmatpush.bf16.msrb.mxu3 %v3257_v49  ;;  %v987_v49 = vld [vmem:[#allocation4 + $0x20] sm:$0xff] }
 0x269   : > { %1968 = vmatmul.bf16.vlgmr.msra.gmra.mxu2 %v4579_v40  ;;  %1987 = vmatmul.bf16.vlgmr.msra.gmra.mxu3 %v4581_v29 }
 0x272   : > { %1935 = vmatmul.bf16.gmra.mxu0 %v4614_v33  ;;  %1954 = vmatmul.bf16.gmra.mxu1 %v4616_v57 }
 0x279   : > { %1973 = vmatmul.bf16.gmra.mxu2 %v4637_v56  ;;  %1992 = vmatmul.bf16.gmra.mxu3 %v4639_v5 }
 0x282   : > { %2006 = vmatmul.bf16.vlgmr.msrb.gmra.mxu0 %v4555_v6  ;;  %2025 = vmatmul.bf16.vlgmr.msrb.gmra.mxu1 %v4557_v7 }
 0x289   : > { %2044 = vmatmul.bf16.vlgmr.msrb.gmra.mxu2 %v4579_v40  ;;  %2063 = vmatmul.bf16.vlgmr.msrb.gmra.mxu3 %v4581_v29 }
 0x292   : > { %2011 = vmatmul.bf16.gmra.mxu0 %v4614_v33  ;;  %2030 = vmatmul.bf16.gmra.mxu1 %v4616_v57 }
 0x299   : > { %2049 = vmatmul.bf16.gmra.mxu2 %v4637_v56  ;;  %2068 = vmatmul.bf16.gmra.mxu3 %v4639_v5 }
 0x29f   : > { %v1779_v50 = vpop.f32.mrf.mxu0  ;;  %v1798_v62 = vpop.f32.mrf.mxu1 }
 0x2a0   : > { %v1799_v34 = vadd.f32 %v1798_v62, %v1779_v50 }
 0x2a7   : > { %v1781_v31 = vpop.f32.mrf.mxu0  ;;  %v1800_v32 = vpop.f32.mrf.mxu1 }
 0x2a8   : > { %v1801_v33 = vadd.f32 %v1800_v32, %v1781_v31 }
 0x2ac   : > { %v1817_v6 = vpop.f32.mrf.mxu2  ;;  %v1836_v35 = vpop.f32.mrf.mxu3 }
 0x2ad   : > { %v1818_v7 = vadd.f32 %v1817_v6, %v1799_v34 }
 0x2af   : > { %v1837_v40 = vadd.f32 %v1836_v35, %v1818_v7  ;;  %v1784_v1 = vpop.f32.mrf.mxu0  ;;  %v1803_v29 = vpop.f32.mrf.mxu1 }
 0x2b0   : > { %v1804_v46 = vadd.f32 %v1803_v29, %v1784_v1 }
 0x2b1   : > { %v2074_v2 = vadd.f32 %v1837_v40, %v978_v38  ;;  %v991_v38 = vld [vmem:[#allocation4 + $0x70] sm:$0xff] }
 0x2b3   : > { %2090 = vst [vmem:[#allocation4 + $0x30] sm:$0xff] %v2074_v2 }
 0x2b4   : > { %v1819_v57 = vpop.f32.mrf.mxu2  ;;  %v1838_v39 = vpop.f32.mrf.mxu3 }
 0x2b5   : > { %v1820_v56 = vadd.f32 %v1819_v57, %v1801_v33 }
 0x2b7   : > { %v1839_v5 = vadd.f32 %v1838_v39, %v1820_v56  ;;  %v1786_v42 = vpop.f32.mrf.mxu0  ;;  %v1805_v43 = vpop.f32.mrf.mxu1 }
 0x2b8   : > { %v1806_v54 = vadd.f32 %v1805_v43, %v1786_v42 }
 0x2b9   : > { %v2078_v45 = vadd.f32 %v1839_v5, %v982_v41  ;;  %v980_v41 = vld [vmem:[#allocation4 + $0x58] sm:$0xff] }
 0x2bb   : > { %2094 = vst [vmem:[#allocation4 + $0x50] sm:$0xff] %v2078_v45 }
 0x2bc   : > { %v1822_v30 = vpop.f32.mrf.mxu2  ;;  %v1841_v47 = vpop.f32.mrf.mxu3 }
 0x2bd   : > { %v1823_v24 = vadd.f32 %v1822_v30, %v1804_v46 }
 0x2bf   : > { %v1842_v48 = vadd.f32 %v1841_v47, %v1823_v24  ;;  %v1855_v51 = vpop.f32.mrf.mxu0  ;;  %v1874_v52 = vpop.f32.mrf.mxu1 }
 0x2c0   : > { %v1875_v37 = vadd.f32 %v1874_v52, %v1855_v51 }
 0x2c1   : > { %v2082_v53 = vadd.f32 %v1842_v48, %v986_v27  ;;  %v984_v27 = vld [vmem:[#allocation4 + $0x8] sm:$0xff] }
 0x2c3   : > { %2098 = vst [vmem:[#allocation4 + $0x40] sm:$0xff] %v2082_v53 }
 0x2c4   : > { %v1824_v55 = vpop.f32.mrf.mxu2  ;;  %v1843_v58 = vpop.f32.mrf.mxu3 }
 0x2c5   : > { %v1825_v59 = vadd.f32 %v1824_v55, %v1806_v54 }
 0x2c7   : > { %v1844_v0 = vadd.f32 %v1843_v58, %v1825_v59  ;;  %v1857_v3 = vpop.f32.mrf.mxu0  ;;  %v1876_v10 = vpop.f32.mrf.mxu1 }
 0x2c8   : > { %v1877_v15 = vadd.f32 %v1876_v10, %v1857_v3 }
 0x2c9   : > { %v2086_v4 = vadd.f32 %v1844_v0, %v990_v36  ;;  %v988_v36 = vld [vmem:[#allocation4 + $0x10] sm:$0xff] }
 0x2cb   : > { %2102 = vst [vmem:[#allocation4 + $0x60] sm:$0xff] %v2086_v4 }
 0x2cc   : > { %v1893_v8 = vpop.f32.mrf.mxu2  ;;  %v1912_v9 = vpop.f32.mrf.mxu3 }
 0x2cd   : > { %v1894_v11 = vadd.f32 %v1893_v8, %v1875_v37 }
 0x2cf   : > { %v1913_v13 = vadd.f32 %v1912_v9, %v1894_v11  ;;  %v1860_v14 = vpop.f32.mrf.mxu0  ;;  %v1879_v60 = vpop.f32.mrf.mxu1 }
 0x2d0   : > { %v1880_v22 = vadd.f32 %v1879_v60, %v1860_v14 }
 0x2d1   : > { %v2075_v63 = vadd.f32 %v1913_v13, %v979_v12  ;;  %v992_v12 = vld [vmem:[#allocation4 + $0x78] sm:$0xff] }
 0x2d3   : > { %2091 = vst [vmem:[#allocation4] sm:$0xff] %v2075_v63 }
 0x2d4   : > { %v1895_v16 = vpop.f32.mrf.mxu2  ;;  %v1914_v17 = vpop.f32.mrf.mxu3 }
 0x2d5   : > { %v1896_v18 = vadd.f32 %v1895_v16, %v1877_v15 }
 0x2d7   : > { %v1915_v26 = vadd.f32 %v1914_v17, %v1896_v18  ;;  %v1862_v19 = vpop.f32.mrf.mxu0  ;;  %v1881_v20 = vpop.f32.mrf.mxu1 }
 0x2d8   : > { %v1882_v34 = vadd.f32 %v1881_v20, %v1862_v19 }
 0x2d9   : > { %v2079_v21 = vadd.f32 %v1915_v26, %v983_v25  ;;  %v981_v25 = vld [vmem:[#allocation4 + $0x18] sm:$0xff] }
 0x2db   : > { %2095 = vst [vmem:[#allocation4 + $0x68] sm:$0xff] %v2079_v21 }
 0x2dc   : > { %v1898_v23 = vpop.f32.mrf.mxu2  ;;  %v1917_v28 = vpop.f32.mrf.mxu3 }
 0x2dd   : > { %v1899_v61 = vadd.f32 %v1898_v23, %v1880_v22 }
 0x2df   : > { %v1918_v50 = vadd.f32 %v1917_v28, %v1899_v61  ;;  %v1931_v62 = vpop.f32.mrf.mxu0  ;;  %v1950_v31 = vpop.f32.mrf.mxu1 }
 0x2e0   : > { %v1951_v33 = vadd.f32 %v1950_v31, %v1931_v62 }
 0x2e1   : > { %v2083_v32 = vadd.f32 %v1918_v50, %v987_v49  ;;  %v985_v49 = vld [vmem:[#allocation4 + $0x48] sm:$0xff] }
 0x2e3   : > { %2099 = vst [vmem:[#allocation4 + $0x20] sm:$0xff] %v2083_v32 }
 0x2e4   : > { %v1900_v6 = vpop.f32.mrf.mxu2  ;;  %v1919_v35 = vpop.f32.mrf.mxu3 }
 0x2e5   : > { %v1901_v7 = vadd.f32 %v1900_v6, %v1882_v34 }
 0x2e7   : > { %v1920_v40 = vadd.f32 %v1919_v35, %v1901_v7  ;;  %v1933_v1 = vpop.f32.mrf.mxu0  ;;  %v1952_v29 = vpop.f32.mrf.mxu1  ;;  %v989_v35 = vld [vmem:[#allocation4 + $0x38] sm:$0xff] }
 0x2e8   : > { %v1953_v46 = vadd.f32 %v1952_v29, %v1933_v1 }
 0x2e9   : > { %v2087_v2 = vadd.f32 %v1920_v40, %v991_v38 }
 0x2eb   : > { %2103 = vst [vmem:[#allocation4 + $0x70] sm:$0xff] %v2087_v2 }
 0x2ec   : > { %v1969_v57 = vpop.f32.mrf.mxu2  ;;  %v1988_v39 = vpop.f32.mrf.mxu3 }
 0x2ed   : > { %v1970_v56 = vadd.f32 %v1969_v57, %v1951_v33  ;;  %v993_v57 = vld [vmem:[#allocation4 + $0x28] sm:$0xff] }
 0x2ef   : > { %v1989_v5 = vadd.f32 %v1988_v39, %v1970_v56  ;;  %v1936_v42 = vpop.f32.mrf.mxu0  ;;  %v1955_v43 = vpop.f32.mrf.mxu1 }
 0x2f0   : > { %v1956_v54 = vadd.f32 %v1955_v43, %v1936_v42 }
 0x2f1   : > { %v2076_v45 = vadd.f32 %v1989_v5, %v980_v41 }
 0x2f3   : > { %2092 = vst [vmem:[#allocation4 + $0x58] sm:$0xff] %v2076_v45 }
 0x2f4   : > { %v1971_v30 = vpop.f32.mrf.mxu2  ;;  %v1990_v47 = vpop.f32.mrf.mxu3 }
 0x2f5   : > { %v1972_v24 = vadd.f32 %v1971_v30, %v1953_v46 }
 0x2f7   : > { %v1991_v48 = vadd.f32 %v1990_v47, %v1972_v24  ;;  %v1938_v51 = vpop.f32.mrf.mxu0  ;;  %v1957_v52 = vpop.f32.mrf.mxu1 }
 0x2f8   : > { %v1958_v37 = vadd.f32 %v1957_v52, %v1938_v51 }
 0x2f9   : > { %v2080_v53 = vadd.f32 %v1991_v48, %v984_v27 }
 0x2fb   : > { %2096 = vst [vmem:[#allocation4 + $0x8] sm:$0xff] %v2080_v53 }
 0x2fc   : > { %v1974_v55 = vpop.f32.mrf.mxu2  ;;  %v1993_v58 = vpop.f32.mrf.mxu3 }
 0x2fd   : > { %v1975_v59 = vadd.f32 %v1974_v55, %v1956_v54 }
 0x2ff   : > { %v1994_v0 = vadd.f32 %v1993_v58, %v1975_v59  ;;  %v2007_v10 = vpop.f32.mrf.mxu0  ;;  %v2026_v4 = vpop.f32.mrf.mxu1 }
 0x300   : > { %v2027_v60 = vadd.f32 %v2026_v4, %v2007_v10 }
 0x301   : > { %v2084_v3 = vadd.f32 %v1994_v0, %v988_v36 }
 0x303   : > { %2100 = vst [vmem:[#allocation4 + $0x10] sm:$0xff] %v2084_v3 }
 0x304   : > { %v1976_v8 = vpop.f32.mrf.mxu2  ;;  %v1995_v9 = vpop.f32.mrf.mxu3 }
 0x305   : > { %v1977_v11 = vadd.f32 %v1976_v8, %v1958_v37 }
 0x307   : > { %v1996_v13 = vadd.f32 %v1995_v9, %v1977_v11  ;;  %v2009_v63 = vpop.f32.mrf.mxu0  ;;  %v2028_v15 = vpop.f32.mrf.mxu1 }
 0x308   : > { %v2029_v20 = vadd.f32 %v2028_v15, %v2009_v63 }
 0x309   : > { %v2088_v14 = vadd.f32 %v1996_v13, %v992_v12 }
 0x30b   : > { %2104 = vst [vmem:[#allocation4 + $0x78] sm:$0xff] %v2088_v14 }
 0x30c   : > { %v2045_v16 = vpop.f32.mrf.mxu2  ;;  %v2064_v17 = vpop.f32.mrf.mxu3 }
 0x30d   : > { %v2046_v18 = vadd.f32 %v2045_v16, %v2027_v60 }
 0x30f   : > { %v2065_v26 = vadd.f32 %v2064_v17, %v2046_v18  ;;  %v2012_v28 = vpop.f32.mrf.mxu0  ;;  %v2031_v61 = vpop.f32.mrf.mxu1 }
 0x310   : > { %v2032_v31 = vadd.f32 %v2031_v61, %v2012_v28 }
 0x311   : > { %v2077_v19 = vadd.f32 %v2065_v26, %v981_v25 }
 0x313   : > { %2093 = vst [vmem:[#allocation4 + $0x18] sm:$0xff] %v2077_v19 }
 0x314   : > { %v2047_v21 = vpop.f32.mrf.mxu2  ;;  %v2066_v22 = vpop.f32.mrf.mxu3 }
 0x315   : > { %v2048_v23 = vadd.f32 %v2047_v21, %v2029_v20 }
 0x317   : > { %v2067_v50 = vadd.f32 %v2066_v22, %v2048_v23  ;;  %v2014_v38 = vpop.f32.mrf.mxu0  ;;  %v2033_v40 = vpop.f32.mrf.mxu1 }
 0x318   : > { %v2034_v29 = vadd.f32 %v2033_v40, %v2014_v38 }
 0x319   : > { %v2081_v62 = vadd.f32 %v2067_v50, %v985_v49 }
 0x31b   : > { %2097 = vst [vmem:[#allocation4 + $0x48] sm:$0xff] %v2081_v62 }
 0x31c   : > { %v2050_v32 = vpop.f32.mrf.mxu2  ;;  %v2069_v34 = vpop.f32.mrf.mxu3 }
 0x31d   : > { %v2051_v6 = vadd.f32 %v2050_v32, %v2032_v31 }
 0x31f   : > { %v2070_v7 = vadd.f32 %v2069_v34, %v2051_v6 }
 0x321   : > { %v2085_v1 = vadd.f32 %v2070_v7, %v989_v35 }
 0x323   : > { %2101 = vst [vmem:[#allocation4 + $0x38] sm:$0xff] %v2085_v1 }
 0x324   : > { %v2052_v2 = vpop.f32.mrf.mxu2  ;;  %v2071_v39 = vpop.f32.mrf.mxu3 }
 0x325   : > { %v2053_v33 = vadd.f32 %v2052_v2, %v2034_v29 }
 0x327   : > { %v2072_v56 = vadd.f32 %v2071_v39, %v2053_v33  ;;  %2109 = sbr.rel (%p3370_p1) target bundleno = 1934 (0x78e), region = 112 }
 0x329   : > { %v2089_v41 = vadd.f32 %v2072_v56, %v993_v57 }
 0x32b   : > { %2105 = vst [vmem:[#allocation4 + $0x28] sm:$0xff] %v2089_v41 }
 0x32c   : > { %v3373_v5 = vld [vmem:[#allocation13] sm:$0xf]  ;;  %v3540_v42 = vld [vmem:[#allocation13 + $0xc] sm:$0x10]  ;;  %v3538_v43 = vld [vmem:[#allocation13 + $0x4] sm:$0xf] }
 0x32d   : > { %v3374_v45 = vor.u32 %v3540_v42, %v3373_v5  ;;  %v3375_v46 = vld [vmem:[#allocation13 + $0x10] sm:$0x10]  ;;  %v3381_v30 = vld [vmem:[#allocation13 + $0x8] sm:$0xf]  ;;  %v3541_v47 = vld [vmem:[#allocation13 + $0x14] sm:$0x10] }
 0x32e   : > { %v3378_v24 = vor.u32 %v3538_v43, %v3375_v46  ;;  %v3382_v27 = vor.u32 %v3541_v47, %v3381_v30  ;;  %v3539_v48 = vld [vmem:[#allocation13 + $0xc] sm:$0xf]  ;;  %v3383_v51 = vld [vmem:[#allocation13 + $0x18] sm:$0x10]  ;;  %v2115_v36 = vld [vmem:[#allocation4 + $0x68] sm:$0xff] }
 0x32f   : > { %v2110_v52 = vld [vmem:[#allocation4 + $0x30] sm:$0xff]  ;;  %2211 = vmatpush.bf16.xpose.msra.mxu0 %v3374_v45  ;;  %v3386_v53 = vor.u32 %v3539_v48, %v3383_v51  ;;  %v2126_v55 = vld [vmem:[#allocation11] sm:$0xf]  ;;  %v2112_v3 = vld [vmem:[#allocation4 + $0x58] sm:$0xff] }
 0x330   : > { %v2114_v54 = vld [vmem:[#allocation4 + $0x50] sm:$0xff]  ;;  %v2111_v58 = vld [vmem:[#allocation4] sm:$0xff]  ;;  %2230 = vmatpush.bf16.xpose.msra.mxu1 %v3378_v24  ;;  %2249 = vmatpush.bf16.xpose.msra.mxu2 %v3382_v27  ;;  %v2128_v59 = vperm.slane %v2126_v55, 0  ;;  %v2129_v0 = vperm.slane %v2126_v55, 1  ;;  %v2116_v10 = vld [vmem:[#allocation4 + $0x8] sm:$0xff]  ;;  %v2130_v4 = vperm.slane %v2126_v55, 2 }
 0x331   : > { %2268 = vmatpush.bf16.xpose.msra.mxu3 %v3386_v53  ;;  %v2113_v37 = vld [vmem:[#allocation4 + $0x18] sm:$0xff]  ;;  %v2117_v8 = vld [vmem:[#allocation4 + $0x48] sm:$0xff]  ;;  %v2131_v9 = vperm.slane %v2126_v55, 3  ;;  %v2118_v50 = vld [vmem:[#allocation4 + $0x40] sm:$0xff] }
 0x332   : > { %v2136_v11 = vadd.f32 %v2128_v59, %v2110_v52  ;;  %v2140_v12 = vadd.f32 %v2128_v59, %v2114_v54  ;;  %v2137_v13 = vadd.f32 %v2129_v0, %v2111_v58  ;;  %v2141_v14 = vadd.f32 %v2129_v0, %v2115_v36  ;;  %v2122_v62 = vld [vmem:[#allocation4 + $0x60] sm:$0xff]  ;;  %v2123_v32 = vld [vmem:[#allocation4 + $0x70] sm:$0xff]  ;;  %v2124_v6 = vld [vmem:[#allocation4 + $0x78] sm:$0xff] }
 0x333   : > { %v2138_v60 = vadd.f32 %v2130_v4, %v2112_v3  ;;  %v2142_v63 = vadd.f32 %v2130_v4, %v2116_v10  ;;  %v2139_v15 = vadd.f32 %v2131_v9, %v2113_v37  ;;  %v2143_v16 = vadd.f32 %v2131_v9, %v2117_v8  ;;  %v2119_v31 = vld [vmem:[#allocation4 + $0x20] sm:$0xff]  ;;  %v2120_v34 = vld [vmem:[#allocation4 + $0x10] sm:$0xff]  ;;  %v2121_v35 = vld [vmem:[#allocation4 + $0x38] sm:$0xff] }
 0x334   : > { %v2152_v17 = vmax.f32 %v2136_v11, 0.0  ;;  %v2156_v18 = vmax.f32 %v2140_v12, 0.0  ;;  %v2153_v25 = vmax.f32 %v2137_v13, 0.0  ;;  %v2157_v26 = vmax.f32 %v2141_v14, 0.0  ;;  %v2125_v7 = vld [vmem:[#allocation4 + $0x28] sm:$0xff] }
 0x335   : > { %v2154_v19 = vmax.f32 %v2138_v60, 0.0  ;;  %v2158_v20 = vmax.f32 %v2142_v63, 0.0  ;;  %v2155_v21 = vmax.f32 %v2139_v15, 0.0  ;;  %v2159_v22 = vmax.f32 %v2143_v16, 0.0  ;;  %v3664_v51 = vld [vmem:[#allocation14] ss:$0 sm:$0xff] }
 0x336   : > { %v2168_v23 = vpack.c.bf16 %v2156_v18, %v2152_v17  ;;  %v2169_v28 = vpack.c.bf16 %v2157_v26, %v2153_v25  ;;  %v2144_v38 = vadd.f32 %v2128_v59, %v2118_v50  ;;  %v2148_v40 = vadd.f32 %v2128_v59, %v2122_v62 }
 0x337   : > { %v2170_v61 = vpack.c.bf16 %v2158_v20, %v2154_v19  ;;  %v2171_v49 = vpack.c.bf16 %v2159_v22, %v2155_v21  ;;  %v2145_v1 = vadd.f32 %v2129_v0, %v2119_v31  ;;  %v2149_v29 = vadd.f32 %v2129_v0, %v2123_v32 }
 0x338   : > { %2212 = vmatmul.bf16.vlgmr.msra.gmra.mxu0 %v2168_v23  ;;  %2231 = vmatmul.bf16.vlgmr.msra.gmra.mxu1 %v2169_v28  ;;  %v2146_v2 = vadd.f32 %v2130_v4, %v2120_v34  ;;  %v2150_v33 = vadd.f32 %v2130_v4, %v2124_v6  ;;  %v2147_v57 = vadd.f32 %v2131_v9, %v2121_v35  ;;  %v2160_v56 = vmax.f32 %v2144_v38, 0.0 }
 0x339   : > { %2250 = vmatmul.bf16.vlgmr.msra.gmra.mxu2 %v2170_v61  ;;  %2269 = vmatmul.bf16.vlgmr.msra.gmra.mxu3 %v2171_v49  ;;  %v2151_v39 = vadd.f32 %v2131_v9, %v2125_v7  ;;  %v2164_v41 = vmax.f32 %v2148_v40, 0.0  ;;  %v2161_v5 = vmax.f32 %v2145_v1, 0.0  ;;  %v2165_v42 = vmax.f32 %v2149_v29, 0.0 }
 0x33a   : > { %v2162_v43 = vmax.f32 %v2146_v2, 0.0  ;;  %v2166_v45 = vmax.f32 %v2150_v33, 0.0  ;;  %v2163_v46 = vmax.f32 %v2147_v57, 0.0 }
 0x33b   : > { %v2167_v30 = vmax.f32 %v2151_v39, 0.0  ;;  %v2172_v47 = vpack.c.bf16 %v2164_v41, %v2160_v56  ;;  %v2173_v24 = vpack.c.bf16 %v2165_v42, %v2161_v5 }
 0x33c   : > { %v2174_v27 = vpack.c.bf16 %v2166_v45, %v2162_v43 }
 0x33d   : > { %v2175_v48 = vpack.c.bf16 %v2167_v30, %v2163_v46 }
 0x348   : > { %2217 = vmatmul.bf16.gmra.mxu0 %v2172_v47  ;;  %2236 = vmatmul.bf16.gmra.mxu1 %v2173_v24 }
 0x349   : > { %2255 = vmatmul.bf16.gmra.mxu2 %v2174_v27  ;;  %2274 = vmatmul.bf16.gmra.mxu3 %v2175_v48 }
 0x3b5   : > { %v2213_v52 = vpop.f32.mrf.mxu0  ;;  %v2232_v53 = vpop.f32.mrf.mxu1 }
 0x3b6   : > { %v2214_v54 = vadd.f32 %v3664_v51, %v2213_v52  ;;  %v2452_v52 = vld [vmem:[#allocation16] sm:$0x7] }
 0x3b8   : > { %v2233_v55 = vadd.f32 %v2232_v53, %v2214_v54  ;;  %v2453_v53 = vld [vmem:[#allocation17] sm:$0x7] }
 0x3bc   : > { %v2251_v58 = vpop.f32.mrf.mxu2  ;;  %v2270_v59 = vpop.f32.mrf.mxu3 }
 0x3bd   : > { %v2252_v36 = vadd.f32 %v2251_v58, %v2233_v55  ;;  %v2215_v0 = vpop.f32.mrf.mxu0  ;;  %v2234_v3 = vpop.f32.mrf.mxu1  ;;  %v2463_v55 = vand.u32 %v2452_v52, %v4346_v44  ;;  %v4784_v58 = vand.u32 %v2453_v53, %v4346_v44 }
 0x3be   : > { %v2216_v4 = vadd.f32 %v3664_v51, %v2215_v0 }
 0x3bf   : > { %v2271_v10 = vadd.f32 %v2270_v59, %v2252_v36  ;;  %2472 = vmatpush.bf16.msrb.mxu0 %v2463_v55  ;;  %2508 = vmatpush.bf16.msrb.mxu1 %v4784_v58 }
 0x3c0   : > { %v2235_v8 = vadd.f32 %v2234_v3, %v2216_v4  ;;  %2625 = vmatpush.bf16.msrb.mxu3 %v2463_v55 }
 0x3c1   : > { %v2280_v37 = vsel %vm838_vm5, %v2271_v10, -inf  ;;  %v2376_v31 = vsub.f32 0.0, %v2271_v10 }
 0x3c2   : > { %2281 = vmax.xlane.f32.xlu0 %v2280_v37 }
 0x3c3   : > { %v2380_v34 = vmul.f32 1.442695, %v2376_v31 }
 0x3c4   : > { %v2253_v9 = vpop.f32.mrf.mxu2  ;;  %v2272_v11 = vpop.f32.mrf.mxu3 }
 0x3c5   : > { %v2254_v12 = vadd.f32 %v2253_v9, %v2235_v8  ;;  %v2218_v13 = vpop.f32.mrf.mxu0  ;;  %v2237_v63 = vpop.f32.mrf.mxu1  ;;  %3666 = vpow2.f32 %v2380_v34 }
 0x3c6   : > { %v2219_v14 = vadd.f32 %v3664_v51, %v2218_v13 }
 0x3c7   : > { %v2273_v60 = vadd.f32 %v2272_v11, %v2254_v12 }
 0x3c8   : > { %v2238_v15 = vadd.f32 %v2237_v63, %v2219_v14 }
 0x3c9   : > { %v2283_v16 = vsel %vm838_vm5, %v2273_v60, -inf  ;;  %v2377_v32 = vsub.f32 0.0, %v2273_v60 }
 0x3ca   : > { %2284 = vmax.xlane.f32.xlu0 %v2283_v16 }
 0x3cb   : > { %v2382_v6 = vmul.f32 1.442695, %v2377_v32  ;;  %v3667_v33 = vpop.eup %3666 }
 0x3cc   : > { %v2256_v17 = vpop.f32.mrf.mxu2  ;;  %v2275_v18 = vpop.f32.mrf.mxu3  ;;  %v4764_v39 = vadd.f32 1.0, %v3667_v33 }
 0x3cd   : > { %v2257_v25 = vadd.f32 %v2256_v17, %v2238_v15  ;;  %v2220_v26 = vpop.f32.mrf.mxu0  ;;  %v2239_v22 = vpop.f32.mrf.mxu1  ;;  %3668 = vpow2.f32 %v2382_v6 }
 0x3ce   : > { %v2221_v20 = vadd.f32 %v3664_v51, %v2220_v26  ;;  %vm2397_vm9 = vweird.f32 %v4764_v39 }
 0x3cf   : > { %v2276_v19 = vadd.f32 %v2275_v18, %v2257_v25 }
 0x3d0   : > { %v2240_v23 = vadd.f32 %v2239_v22, %v2221_v20 }
 0x3d1   : > { %v2286_v21 = vsel %vm838_vm5, %v2276_v19, -inf  ;;  %v2378_v7 = vsub.f32 0.0, %v2276_v19 }
 0x3d2   : > { %2287 = vmax.xlane.f32.xlu1 %v2286_v21 }
 0x3d3   : > { %v2384_v40 = vmul.f32 1.442695, %v2378_v7  ;;  %v3669_v57 = vpop.eup %3668 }
 0x3d4   : > { %v2258_v28 = vpop.f32.mrf.mxu2  ;;  %v2277_v49 = vpop.f32.mrf.mxu3  ;;  %v4766_v56 = vadd.f32 1.0, %v3669_v57 }
 0x3d5   : > { %v2259_v61 = vadd.f32 %v2258_v28, %v2240_v23 }
 0x3d6   : > { %v2416_v20 = vand.u32 2147483647, %v4766_v56  ;;  %v2418_v21 = vand.u32 2147483648, %v4766_v56  ;;  %vm2412_vm8 = vweird.f32 %v4766_v56 }
 0x3d7   : > { %v4759_v50 = vadd.f32 %v2277_v49, %v2259_v61  ;;  %v2403_v61 = vand.u32 2147483648, %v4764_v39 }
 0x3d8   : > { %vm2417_vm13 = vcmp.eq.f32.partialorder %v2416_v20, 8.507059e+37  ;;  %v2419_v6 = vor.u32 1.1754944e-38, %v2418_v21 }
 0x3d9   : > { %v2289_v62 = vsel %vm838_vm5, %v4759_v50, -inf  ;;  %v2379_v35 = vsub.f32 0.0, %v4759_v50 }
 0x3da   : > { %2290 = vmax.xlane.f32.xlu1 %v2289_v62  ;;  %v2401_v62 = vand.u32 2147483647, %v4764_v39 }
 0x3db   : > { %v2386_v38 = vmul.f32 1.442695, %v2379_v35 }
 0x3dc   : > { %vm2402_vm1 = vcmp.eq.f32.partialorder %v2401_v62, 8.507059e+37 }
 0x3dd   : > { %3670 = vpow2.f32 %v2386_v38 }
 0x3de   : > { %3672 = vpow2.f32 %v2384_v40  ;;  %v2404_v40 = vor.u32 1.1754944e-38, %v2403_v61 }
 0x3e3   : > { %v3671_v5 = vpop.eup %3670 }
 0x3e4   : > { %v3673_v43 = vpop.eup %3672  ;;  %v4772_v30 = vadd.f32 1.0, %v3671_v5 }
 0x3e5   : > { %v4776_v24 = vadd.f32 1.0, %v3673_v43 }
 0x3e6   : > { %v2448_v35 = vand.u32 2147483648, %v4772_v30  ;;  %vm2442_vm15 = vweird.f32 %v4772_v30  ;;  %v2446_v38 = vand.u32 2147483647, %v4772_v30 }
 0x3e7   : > { %vm2427_vm2 = vweird.f32 %v4776_v24 }
 0x3e8   : > { %vm2447_vm4 = vcmp.eq.f32.partialorder %v2446_v38, 8.507059e+37 }
 0x435   : > { %v2282_v1 = vpop.xlane.xlu0 %2281 }
 0x436   : > { %v2292_v29 = vsub.f32 %v2271_v10, %v2282_v1 }
 0x438   : > { %v2296_v2 = vmul.f32 1.442695, %v2292_v29  ;;  %v2433_v29 = vand.u32 2147483648, %v4776_v24 }
 0x43a   : > { %3674 = vpow2.f32 %v2296_v2  ;;  %v2431_v2 = vand.u32 2147483647, %v4776_v24  ;;  %v2434_v5 = vor.u32 1.1754944e-38, %v2433_v29 }
 0x43b   : > { %3676 = vrcp.f32 %v4764_v39 }
 0x43c   : > { %3678 = vrcp.f32 %v4766_v56 }
 0x43d   : > { %v2285_v41 = vpop.xlane.xlu0 %2284 }
 0x43e   : > { %v2293_v42 = vsub.f32 %v2273_v60, %v2285_v41 }
 0x440   : > { %v4768_v45 = vpop.eup %3674  ;;  %v2298_v46 = vmul.f32 1.442695, %v2293_v42 }
 0x441   : > { %v2304_v47 = vsel %vm838_vm5, %v4768_v45, 0.0  ;;  %v4779_v48 = vpop.eup %3676 }
 0x442   : > { %3680 = vpow2.f32 %v2298_v46  ;;  %2305 = vadd.xlane.f32.xlu2 %v2304_v47  ;;  %v3679_v54 = vpop.eup %3678  ;;  %v2393_v44 = vmul.f32 %v4779_v48, %v4764_v39  ;;  %vm2398_vm7 = vweird.f32 %v4779_v48  ;;  %v2449_v39 = vor.u32 1.1754944e-38, %v2448_v35 }
 0x443   : > { %3682 = vrcp.f32 %v4772_v30  ;;  %v2408_v3 = vmul.f32 %v3679_v54, %v4766_v56  ;;  %vm2413_vm6 = vweird.f32 %v3679_v54  ;;  %vm4825_vm11 = vmor %vm2397_vm9, %vm2398_vm7 }
 0x444   : > { %3684 = vrcp.f32 %v4776_v24  ;;  %v2394_v12 = vsub.f32 1.0, %v2393_v44  ;;  %vm4821_vm10 = vmor %vm2412_vm8, %vm2413_vm6  ;;  %vm2432_vm6 = vcmp.eq.f32.partialorder %v2431_v2, 8.507059e+37 }
 0x445   : > { %v2288_v27 = vpop.xlane.xlu1 %2287  ;;  %v2409_v9 = vsub.f32 1.0, %v2408_v3 }
 0x446   : > { %v2294_v51 = vsub.f32 %v2276_v19, %v2288_v27  ;;  %v2395_v17 = vmul.f32 %v4779_v48, %v2394_v12 }
 0x447   : > { %v2410_v15 = vmul.f32 %v3679_v54, %v2409_v9 }
 0x448   : > { %v4786_v59 = vpop.eup %3680  ;;  %v2300_v36 = vmul.f32 1.442695, %v2294_v51  ;;  %v2396_v19 = vadd.f32 %v4779_v48, %v2395_v17 }
 0x449   : > { %v2307_v0 = vsel %vm838_vm5, %v4786_v59, 0.0  ;;  %v4792_v10 = vpop.eup %3682  ;;  %v2411_v25 = vadd.f32 %v3679_v54, %v2410_v15 }
 0x44a   : > { %3686 = vpow2.f32 %v2300_v36  ;;  %2308 = vadd.xlane.f32.xlu2 %v2307_v0  ;;  %v4796_v4 = vpop.eup %3684  ;;  %v2438_v11 = vmul.f32 %v4792_v10, %v4772_v30  ;;  %vm2443_vm12 = vweird.f32 %v4792_v10  ;;  %v2400_v34 = vsel %vm4825_vm11, %v4779_v48, %v2396_v19 }
 0x44b   : > { %v2423_v60 = vmul.f32 %v4796_v4, %v4776_v24  ;;  %v2415_v31 = vsel %vm4821_vm10, %v3679_v54, %v2411_v25  ;;  %vm2428_vm14 = vweird.f32 %v4796_v4  ;;  %vm2444_vm0 = vmor %vm2442_vm15, %vm2443_vm12  ;;  %v2405_v57 = vsel %vm2402_vm1, %v2404_v40, %v2400_v34 }
 0x44c   : > { %v2439_v16 = vsub.f32 1.0, %v2438_v11  ;;  %v2420_v1 = vsel %vm2417_vm13, %v2419_v6, %v2415_v31  ;;  %vm2429_vm3 = vmor %vm2427_vm2, %vm2428_vm14 }
 0x44d   : > { %v2291_v37 = vpop.xlane.xlu1 %2290  ;;  %v2424_v18 = vsub.f32 1.0, %v2423_v60  ;;  %v2484_v56 = vpack.c.bf16 %v2420_v1, %v2405_v57  ;;  %v3543_v57 = vld [vmem:[%s4950_s29 + $0x8] sm:$0x10] }
 0x44e   : > { %v2295_v8 = vsub.f32 %v4759_v50, %v2291_v37  ;;  %v2440_v26 = vmul.f32 %v4792_v10, %v2439_v16 }
 0x44f   : > { %v2425_v23 = vmul.f32 %v4796_v4, %v2424_v18 }
 0x450   : > { %v4801_v13 = vpop.eup %3686  ;;  %v2302_v14 = vmul.f32 1.442695, %v2295_v8  ;;  %v2441_v32 = vadd.f32 %v4792_v10, %v2440_v26 }
 0x451   : > { %v2310_v63 = vsel %vm838_vm5, %v4801_v13, 0.0  ;;  %v2426_v7 = vadd.f32 %v4796_v4, %v2425_v23 }
 0x452   : > { %3688 = vpow2.f32 %v2302_v14  ;;  %2311 = vadd.xlane.f32.xlu0 %v2310_v63  ;;  %v2445_v33 = vsel %vm2444_vm0, %v4792_v10, %v2441_v32 }
 0x453   : > { %v2430_v41 = vsel %vm2429_vm3, %v4796_v4, %v2426_v7  ;;  %v2450_v42 = vsel %vm2447_vm4, %v2449_v39, %v2445_v33  ;;  %v3397_v33 = vld [vmem:[%s4950_s29 + $0x8] sm:$0xf] }
 0x454   : > { %v2435_v43 = vsel %vm2432_vm6, %v2434_v5, %v2430_v41  ;;  %v3398_v39 = vor.u32 %v3543_v57, %v3397_v33 }
 0x455   : > { %v2485_v46 = vpack.c.bf16 %v2450_v42, %v2435_v43 }
 0x458   : > { %v4813_v22 = vpop.eup %3688 }
 0x459   : > { %v2313_v28 = vsel %vm838_vm5, %v4813_v22, 0.0 }
 0x45a   : > { %2314 = vadd.xlane.f32.xlu1 %v2313_v28 }
 0x462   : > { %2488 = vrot.lane.b32.xlu2 %v2484_v56, %s4046_s9  ;;  %v4047_v56 = vmov 65535  }
 0x466   : > { %2490 = vrot.lane.b32.xlu0 %v2485_v46, %s4046_s9 }
 0x4b5   : > { %v2306_v30 = vpop.xlane.xlu2 %2305 }
 0x4b6   : > { %3690 = vrcp.f32 %v2306_v30  ;;  %v2327_v0 = vand.u32 2147483648, %v2306_v30  ;;  %vm2321_vm8 = vweird.f32 %v2306_v30  ;;  %v2325_v3 = vand.u32 2147483647, %v2306_v30 }
 0x4b8   : > { %v2328_v9 = vor.u32 1.1754944e-38, %v2327_v0  ;;  %vm2326_vm11 = vcmp.eq.f32.partialorder %v2325_v3, 8.507059e+37  ;;  %v3665_v3 = vld [vmem:[%s4951_s8] ss:$0 sm:$0xff] }
 0x4bc   : > { %v3691_v47 = vpop.eup %3690 }
 0x4bd   : > { %v2317_v24 = vmul.f32 %v3691_v47, %v2306_v30  ;;  %v2309_v27 = vpop.xlane.xlu2 %2308  ;;  %vm2322_vm7 = vweird.f32 %v3691_v47 }
 0x4be   : > { %3692 = vrcp.f32 %v2309_v27  ;;  %vm2323_vm9 = vmor %vm2321_vm8, %vm2322_vm7  ;;  %v2342_v44 = vand.u32 2147483648, %v2309_v27  ;;  %v2340_v37 = vand.u32 2147483647, %v2309_v27  ;;  %vm2336_vm12 = vweird.f32 %v2309_v27 }
 0x4bf   : > { %v2318_v48 = vsub.f32 1.0, %v2317_v24  ;;  %vm2551_vm8 = vcmask 1043456  }
 0x4c0   : > { %v2343_v14 = vor.u32 1.1754944e-38, %v2342_v44  ;;  %vm2341_vm14 = vcmp.eq.f32.partialorder %v2340_v37, 8.507059e+37  ;;  %v2553_v41 = vsel %vm2551_vm8, 4294967295, %v4047_v56 }
 0x4c1   : > { %v2319_v51 = vmul.f32 %v3691_v47, %v2318_v48 }
 0x4c3   : > { %v2320_v53 = vadd.f32 %v3691_v47, %v2319_v51 }
 0x4c4   : > { %v3693_v52 = vpop.eup %3692 }
 0x4c5   : > { %v2332_v54 = vmul.f32 %v3693_v52, %v2309_v27  ;;  %v2489_v55 = vpop.permute.xlu2 %2488  ;;  %v2312_v36 = vpop.xlane.xlu0 %2311  ;;  %vm2337_vm10 = vweird.f32 %v3693_v52  ;;  %v2324_v8 = vsel %vm2323_vm9, %v3691_v47, %v2320_v53  ;;  %vm2552_vm9 = vcmask 1044480  }
 0x4c6   : > { %3694 = vrcp.f32 %v2312_v36  ;;  %3389 = vmatmul.msk.bf16.vlgmr.msrb.gmra.mxu1 %vm838_vm5, %v2489_v55  ;;  %vm2338_vm13 = vmor %vm2336_vm12, %vm2337_vm10  ;;  %v2329_v60 = vsel %vm2326_vm11, %v2328_v9, %v2324_v8  ;;  %v2357_v61 = vand.u32 2147483648, %v2312_v36  ;;  %vm2351_vm0 = vweird.f32 %v2312_v36 }
 0x4c7   : > { %v2333_v10 = vsub.f32 1.0, %v2332_v54  ;;  %v2330_v25 = vmul.f32 %v4768_v45, %v2329_v60  ;;  %v2355_v50 = vand.u32 2147483647, %v2312_v36  ;;  %v2554_v5 = vsel %vm2552_vm9, %v2553_v41, 0 }
 0x4c8   : > { %v2358_v34 = vor.u32 1.1754944e-38, %v2357_v61  ;;  %vm2547_vm10 = vcmask 203776  }
 0x4c9   : > { %v2334_v4 = vmul.f32 %v3693_v52, %v2333_v10  ;;  %vm2356_vm4 = vcmp.eq.f32.partialorder %v2355_v50, 8.507059e+37 }
 0x4cb   : > { %v2335_v11 = vadd.f32 %v3693_v52, %v2334_v4 }
 0x4cc   : > { %v3695_v12 = vpop.eup %3694 }
 0x4cd   : > { %v2347_v63 = vmul.f32 %v3695_v12, %v2312_v36  ;;  %v2315_v15 = vpop.xlane.xlu1 %2314  ;;  %v2339_v16 = vsel %vm2338_vm13, %v3693_v52, %v2335_v11  ;;  %vm2352_vm15 = vweird.f32 %v3695_v12 }
 0x4ce   : > { %3696 = vrcp.f32 %v2315_v15  ;;  %v2344_v17 = vsel %vm2341_vm14, %v2343_v14, %v2339_v16  ;;  %v2372_v62 = vand.u32 2147483648, %v2315_v15  ;;  %vm2353_vm1 = vmor %vm2351_vm0, %vm2352_vm15  ;;  %vm2366_vm3 = vweird.f32 %v2315_v15 }
 0x4cf   : > { %v2348_v18 = vsub.f32 1.0, %v2347_v63  ;;  %v2345_v26 = vmul.f32 %v4786_v59, %v2344_v17  ;;  %v2370_v59 = vand.u32 2147483647, %v2315_v15 }
 0x4d0   : > { %v2373_v7 = vor.u32 1.1754944e-38, %v2372_v62 }
 0x4d1   : > { %v2349_v19 = vmul.f32 %v3695_v12, %v2348_v18  ;;  %v2454_v20 = vpack.c.bf16 %v2345_v26, %v2330_v25  ;;  %vm2371_vm7 = vcmp.eq.f32.partialorder %v2370_v59, 8.507059e+37 }
 0x4d3   : > { %3387 = vmatmul.msk.bf16.vlgmr.msrb.gmra.mxu0 %vm838_vm5, %v2454_v20  ;;  %v2350_v28 = vadd.f32 %v3695_v12, %v2349_v19 }
 0x4d4   : > { %v3697_v21 = vpop.eup %3696 }
 0x4d5   : > { %v2362_v23 = vmul.f32 %v3697_v21, %v2315_v15  ;;  %v2354_v45 = vsel %vm2353_vm1, %v3695_v12, %v2350_v28  ;;  %vm2367_vm2 = vweird.f32 %v3697_v21 }
 0x4d6   : > { %v2359_v35 = vsel %vm2356_vm4, %v2358_v34, %v2354_v45  ;;  %vm2368_vm6 = vmor %vm2366_vm3, %vm2367_vm2 }
 0x4d7   : > { %v2363_v49 = vsub.f32 1.0, %v2362_v23  ;;  %v2360_v1 = vmul.f32 %v4801_v13, %v2359_v35  ;;  %v2556_v13 = vand.u32 %v3398_v39, %v2554_v5 }
 0x4d8   : > { %v2491_v31 = vpop.permute.xlu0 %2490 }
 0x4d9   : > { %v2364_v32 = vmul.f32 %v3697_v21, %v2363_v49  ;;  %3390 = vmatmul.msk.bf16.gmra.mxu1 %vm838_vm5, %v2491_v31  ;;  %2564 = vmatpush.bf16.msrb.mxu2 %v2556_v13 }
 0x4db   : > { %v2365_v6 = vadd.f32 %v3697_v21, %v2364_v32 }
 0x4dd   : > { %v2369_v38 = vsel %vm2368_vm6, %v3697_v21, %v2365_v6 }
 0x4de   : > { %v2374_v40 = vsel %vm2371_vm7, %v2373_v7, %v2369_v38 }
 0x4df   : > { %v2375_v29 = vmul.f32 %v4813_v22, %v2374_v40  ;;  %v3542_v22 = vld [vmem:[%s4950_s29] sm:$0xff] }
 0x4e0   : > { %2565 = vmatpush.bf16.msrb.mxu2 %v3542_v22 }
 0x4e1   : > { %v2455_v2 = vpack.c.bf16 %v2375_v29, %v2360_v1 }
 0x4e3   : > { %3388 = vmatmul.msk.bf16.gmra.mxu0 %vm838_vm5, %v2455_v2 }
 0x4e4   : > { %2645 = vmatpush.bf16.msra.mxu2 %v4784_v58 }
 0x543   : > { %v2510_v42 = vpop.f32.mrf.mxu1 }
 0x54b   : > { %v2512_v46 = vpop.f32.mrf.mxu1 }
 0x550   : > { %v2474_v43 = vpop.f32.mrf.mxu0 }
 0x551   : > { %v2520_v48 = vmul.f32 %v2510_v42, %v2474_v43 }
 0x556   : > { %v2515_v47 = vpop.f32.mrf.mxu1 }
 0x558   : > { %v2476_v30 = vpop.f32.mrf.mxu0 }
 0x559   : > { %v2521_v27 = vmul.f32 %v2512_v46, %v2476_v30 }
 0x55b   : > { %v2524_v52 = vadd.f32 %v2521_v27, %v2520_v48 }
 0x55e   : > { %v2517_v53 = vpop.f32.mrf.mxu1 }
 0x560   : > { %v2479_v24 = vpop.f32.mrf.mxu0 }
 0x561   : > { %v2522_v51 = vmul.f32 %v2515_v47, %v2479_v24 }
 0x563   : > { %v2525_v55 = vadd.f32 %v2524_v52, %v2522_v51 }
 0x568   : > { %v2481_v54 = vpop.f32.mrf.mxu0 }
 0x569   : > { %v2523_v36 = vmul.f32 %v2517_v53, %v2481_v54 }
 0x56b   : > { %v4867_v0 = vadd.f32 %v2525_v55, %v2523_v36 }
 0x56d   : > { %v2527_v58 = vpack.c.bf16 %v4867_v0, %v4867_v0 }
 0x56f   : > { %3399 = vmatmul.msk.bf16.vlgmr.msrb.gmra.mxu2 %vm2547_vm10, %v2527_v58 }
 0x5f2   : > { %v2567_v10 = vpop.f32.mrf.mxu2 }
 0x5f3   : > { %v2568_v44 = vadd.f32 %v3665_v3, %v2567_v10 }
 0x5f5   : > { %v2571_v4 = vsel %vm838_vm5, %v2568_v44, -inf  ;;  %v2595_v8 = vsub.f32 0.0, %v2568_v44 }
 0x5f6   : > { %2572 = vmax.xlane.f32.xlu1 %v2571_v4 }
 0x5f7   : > { %v2596_v9 = vmul.f32 1.442695, %v2595_v8 }
 0x5f9   : > { %3698 = vpow2.f32 %v2596_v9 }
 0x5fa   : > { %v2569_v37 = vpop.f32.mrf.mxu2 }
 0x5ff   : > { %v3699_v11 = vpop.eup %3698 }
 0x600   : > { %v2598_v12 = vadd.f32 1.0, %v3699_v11 }
 0x602   : > { %3700 = vrcp.f32 %v2598_v12  ;;  %v2610_v20 = vand.u32 2147483648, %v2598_v12  ;;  %vm2604_vm12 = vweird.f32 %v2598_v12  ;;  %v2608_v21 = vand.u32 2147483647, %v2598_v12 }
 0x604   : > { %v2611_v28 = vor.u32 1.1754944e-38, %v2610_v20  ;;  %vm2609_vm14 = vcmp.eq.f32.partialorder %v2608_v21, 8.507059e+37 }
 0x608   : > { %v3701_v15 = vpop.eup %3700 }
 0x609   : > { %v2600_v18 = vmul.f32 %v3701_v15, %v2598_v12  ;;  %vm2605_vm11 = vweird.f32 %v3701_v15 }
 0x60a   : > { %vm2606_vm13 = vmor %vm2604_vm12, %vm2605_vm11 }
 0x60b   : > { %v2601_v25 = vsub.f32 1.0, %v2600_v18 }
 0x60d   : > { %v2602_v26 = vmul.f32 %v3701_v15, %v2601_v25 }
 0x60f   : > { %v2603_v19 = vadd.f32 %v3701_v15, %v2602_v26 }
 0x611   : > { %v2607_v23 = vsel %vm2606_vm13, %v3701_v15, %v2603_v19 }
 0x612   : > { %v2612_v61 = vsel %vm2609_vm14, %v2611_v28, %v2607_v23 }
 0x613   : > { %v2631_v49 = vpack.c.bf16 %v2612_v61, %v2612_v61 }
 0x669   : > { %v2573_v14 = vpop.xlane.xlu1 %2572 }
 0x66a   : > { %v2574_v60 = vsub.f32 %v2568_v44, %v2573_v14 }
 0x66c   : > { %v2575_v63 = vmul.f32 1.442695, %v2574_v60 }
 0x66e   : > { %3702 = vpow2.f32 %v2575_v63 }
 0x674   : > { %v3703_v16 = vpop.eup %3702 }
 0x675   : > { %v2577_v17 = vsel %vm838_vm5, %v3703_v16, 0.0 }
 0x676   : > { %2578 = vadd.xlane.f32.xlu1 %v2577_v17 }
 0x68f   : > { %2633 = vrot.lane.b32.xlu1 %v2631_v49, %s4046_s9 }
 0x6e9   : > { %v2579_v50 = vpop.xlane.xlu1 %2578 }
 0x6ea   : > { %3704 = vrcp.f32 %v2579_v50  ;;  %v2591_v45 = vand.u32 2147483648, %v2579_v50  ;;  %v2589_v34 = vand.u32 2147483647, %v2579_v50  ;;  %vm2585_vm0 = vweird.f32 %v2579_v50 }
 0x6ec   : > { %v2592_v35 = vor.u32 1.1754944e-38, %v2591_v45  ;;  %vm2590_vm2 = vcmp.eq.f32.partialorder %v2589_v34, 8.507059e+37 }
 0x6f0   : > { %v3705_v62 = vpop.eup %3704 }
 0x6f1   : > { %v2581_v31 = vmul.f32 %v3705_v62, %v2579_v50  ;;  %vm2586_vm15 = vweird.f32 %v3705_v62 }
 0x6f2   : > { %vm2587_vm1 = vmor %vm2585_vm0, %vm2586_vm15 }
 0x6f3   : > { %v2582_v32 = vsub.f32 1.0, %v2581_v31 }
 0x6f5   : > { %v2583_v59 = vmul.f32 %v3705_v62, %v2582_v32 }
 0x6f7   : > { %v2584_v6 = vadd.f32 %v3705_v62, %v2583_v59 }
 0x6f9   : > { %v2588_v7 = vsel %vm2587_vm1, %v3705_v62, %v2584_v6 }
 0x6fa   : > { %v2593_v38 = vsel %vm2590_vm2, %v2592_v35, %v2588_v7 }
 0x6fb   : > { %v2594_v40 = vmul.f32 %v3703_v16, %v2593_v38 }
 0x6fd   : > { %v2614_v1 = vpack.c.bf16 %v2594_v40, %v2594_v40 }
 0x6ff   : > { %3400 = vmatmul.msk.bf16.vlgmr.msrb.gmra.mxu3 %vm838_vm5, %v2614_v1 }
 0x701   : > { %v2634_v29 = vpop.permute.xlu1 %2633 }
 0x702   : > { %3401 = vmatmul.msk.bf16.vlgmr.msra.gmra.mxu2 %vm838_vm5, %v2634_v29 }
 0x782   : > { %v2627_v2 = vpop.f32.mrf.mxu3 }
 0x785   : > { %v2647_v33 = vpop.f32.mrf.mxu2 }
 0x786   : > { %v2651_v57 = vmul.f32 %v2647_v33, %v2627_v2 }
 0x788   : > { %v2652_v39 = vadd.f32 %v2651_v57, %v4867_v0 }
 0x78a   : > { %2653 = vst.msk [vmem:[#allocation19] sm:$0xff] %vm2547_vm10, %v2652_v39  ;;  %v2629_v56 = vpop.f32.mrf.mxu3 }
 0x78d   : > { %v2649_v41 = vpop.f32.mrf.mxu2 }
 0x78e PF: > { %p3611_p3 = scmp.eq.s32.totalorder %s4143_s15, 1  ;;  %s4048_s19 = smov [#allocation19]  }
 0x78f   : > { %s2660_s20 = sshll.u32 %s4048_s19, 4  ;;  %s4952_s7 = sld [smem:[#allocation36_spill]]  ;;  %s2661_s20 = int_to_ptr.vmem [resolvable:$true] %s2660_s20 }
 0x795   : > { %s2662_s11 = sshll.u32 %s4952_s7, 4  ;;  %s2663_s11 = int_to_ptr.hbm [resolvable:$true] %s2662_s11 }
 0x796   : > { %3571 = dma.vmem_to_hbm [thread:$0]  (%p3611_p3), %s2661_s20, 128, %s2663_s11, [#allocation7]  }
 0x797   : > { %4011 = dma.done.wait (%p3611_p3), [#allocation7], 128  }
 0x798   : > { %4013 = vsyncadd (%p3611_p3), [#allocation7], 4294967168 }
 0x799 PF: > { %s4953_s28 = sld [smem:[#allocation27_spill]]  ;;  %s4956_s25 = smov %s4020_s26 }
 0x79a   : > { %s4954_s24 = sld [smem:[#allocation26_spill]] }
 0x79b   : > { %s4955_s27 = sld [smem:[#allocation28_spill]] }
 0x79f   : > { %p30_p13 = scmp.ge.s32.totalorder %s4953_s28, 4  }
 0x7a0   : > { %s4957_s26 = smov %s4954_s24 }
 0x7a1   :  { %32 = sbr.rel (!%p30_p13) target bundleno = 18 (0x12), region = 164 }
 0x7a6   :  { %2676 = vsyncpa [#allocation6], 1 }
 0x7a7   :  { %2678 = vsyncpa [#allocation6 + $0x1], 1 }
 0x7a8   :  { %2679 = vsyncpa [#allocation9], 1 }
 0x7a9   :  { %2681 = vsyncpa [#allocation9 + $0x1], 1 }
 0x7aa   :  { %2682 = vsyncpa [#allocation12], 1 }
 0x7ab   :  { %2683 = vsyncpa [#allocation15], 1 }
 0x7ac   :  { %2684 = vsyncpa [#allocation18], 1 }
 0x7ad   :  { %2685 = vsyncpa [#allocation7], 1 }
 0x7ae   :  { %2687 = vsyncpa [#allocation7 + $0x1], 1 }

</bundles_post_ra>
